<compile_context>
chip_gen: v5e
topology: v5e:2x2
jax: 0.10.0
libtpu: 0.0.40
codegen_flags: <defaults>
</compile_context>

<pallas_src>
import functools

import jax
import jax.numpy as jnp
from jax.experimental import pallas as pl
from jax.experimental.pallas import tpu as pltpu


def gat_kernel(h_ref, ht_ref, w_ref, wa1_ref, wa2r_ref, adj_ref, out_ref, *,
               alpha, block_m, fast_math):
    i = pl.program_id(0)

    # Full-graph "value" matrix Wh = h @ W (every key column is needed by every
    # query tile).  O(N*F_in*F_out) per tile is negligible next to the
    # O(TM*N*F_out) attention matmul; hoist it if F_in*F_out ever gets large.
    Wh = jnp.dot(h_ref[...], w_ref[...],
                 preferred_element_type=jnp.float32)                   # (N, F_out)

    # Query rows of this tile.
    row0 = pl.multiple_of(i * block_m, block_m)
    h_tile = h_ref[pl.ds(row0, block_m), :]                            # (TM, F_in)

    # Attention-logit pieces, both on the MXU.
    #   wh1[i] = (h_i W) . a1 = h_i . (W a1)            -> (TM, 1)
    #   wh2[j] = (h_j W) . a2, produced lane-major      -> (1, N)
    wh1 = jnp.dot(h_tile, wa1_ref[...],
                  preferred_element_type=jnp.float32)                  # (TM, 1)
    wh2 = jnp.dot(wa2r_ref[...], ht_ref[...],
                  preferred_element_type=jnp.float32)                  # (1, N)

    e = wh1 + wh2                                                      # (TM, N)
    e = jnp.where(e > 0, e, alpha * e)                                 # LeakyReLU

    # Row-wise softmax over neighbours with a multiplicative 0/1 mask.
    # Equivalent to where(adj>0, e, -9e15) + softmax for any row with >=1
    # neighbour (masked terms underflow to exactly 0 in the reference too).
    mask = adj_ref[...].astype(jnp.float32)                            # (TM, N)
    m = jnp.max(e, axis=1, keepdims=True)      # >= max over unmasked entries
    p = jnp.exp(e - m) * mask
    denom = jnp.sum(p, axis=1, keepdims=True)
    attn = p * pl.reciprocal(denom, approx=fast_math)

    # attn @ Wh on the MXU; bf16 feed (f32 accumulate) in fast mode.
    mm_dtype = jnp.bfloat16 if fast_math else jnp.float32
    h_prime = jnp.dot(attn.astype(mm_dtype), Wh.astype(mm_dtype),
                      preferred_element_type=jnp.float32)              # (TM, F_out)

    # concat=True -> ELU.
    out_ref[...] = jnp.where(h_prime > 0, h_prime,
                             jnp.exp(h_prime) - 1.0).astype(out_ref.dtype)


def _pick_block_m(n, target):
    """Largest divisor of n that is <= target and a multiple of 32 (safe sublane
    tiling for the int8 adjacency); falls back to the full extent (always legal)."""
    if n <= target:
        return n
    for bm in range(min(target, n), 31, -1):
        if n % bm == 0 and bm % 32 == 0:
            return bm
    return n


def gat_forward(h, W, a, adj, *, alpha=0.2, block_m=256, fast_math=True,
                vmem_limit_bytes=64 * 1024 * 1024):
    h = jnp.asarray(h, jnp.float32)
    W = jnp.asarray(W, jnp.float32)
    a = jnp.asarray(a, jnp.float32)
    N, F_in = h.shape
    F_out = W.shape[1]

    # Fold the attention-vector projections into tiny parameter-side matmuls.
    a_flat = a.reshape(2 * F_out)
    wa1 = (W @ a_flat[:F_out].reshape(F_out, 1)).astype(jnp.float32)    # (F_in, 1)
    wa2r = (W @ a_flat[F_out:].reshape(F_out, 1)).T.astype(jnp.float32)  # (1, F_in)
    ht = h.T                                                            # (F_in, N)

    # Stream the adjacency as int8 (0/1).  Callers with a static graph should
    # keep adj in int8 so this cast happens once, not per forward call.
    if adj.dtype != jnp.int8:
        adj = (adj > 0).astype(jnp.int8)

    bm = _pick_block_m(N, block_m)
    grid = (N // bm,)

    kernel = functools.partial(gat_kernel, alpha=alpha, block_m=bm,
                               fast_math=fast_math)

    return pl.pallas_call(
        kernel,
        out_shape=jax.ShapeDtypeStruct((N, F_out), jnp.float32),
        grid=grid,
        in_specs=[
            pl.BlockSpec((N, F_in), lambda i: (0, 0)),       # h        (resident)
            pl.BlockSpec((F_in, N), lambda i: (0, 0)),       # h^T      (resident)
            pl.BlockSpec((F_in, F_out), lambda i: (0, 0)),   # W        (resident)
            pl.BlockSpec((F_in, 1), lambda i: (0, 0)),       # W @ a1   (resident)
            pl.BlockSpec((1, F_in), lambda i: (0, 0)),       # (W @ a2)^T
            pl.BlockSpec((bm, N), lambda i: (i, 0)),         # adj row tile (int8)
        ],
        out_specs=pl.BlockSpec((bm, F_out), lambda i: (i, 0)),
        compiler_params=pltpu.CompilerParams(
            dimension_semantics=("parallel",),
            vmem_limit_bytes=vmem_limit_bytes),
    )(h, ht, W, wa1, wa2r, adj)


def gat_reference(h, W, a, adj, *, alpha=0.2):
    """Pure-JAX reference mirroring the PyTorch module (eval mode)."""
    Wh = h @ W
    F_out = W.shape[1]
    Wh1 = Wh @ a[:F_out, :]
    Wh2 = Wh @ a[F_out:, :]
    e = Wh1 + Wh2.T
    e = jnp.where(e > 0, e, alpha * e)
    scores = jnp.where(adj > 0, e, -9e15)
    attn = jax.nn.softmax(scores, axis=1)
    h_prime = attn @ Wh
    return jnp.where(h_prime > 0, h_prime, jnp.exp(h_prime) - 1.0)


if __name__ == "__main__":
    key = jax.random.PRNGKey(0)
    k_h, k_w, k_a, k_adj = jax.random.split(key, 4)

    N = 512           # number of graph nodes
    F_in = 16         # in_features
    F_out = 128       # out_features (lane-dense: multiple of 128)
    alpha = 0.2       # LeakyReLU negative slope

    # node features
    h = jax.random.normal(k_h, (N, F_in), dtype=jnp.float32)

    # parameters: xavier_uniform_ with gain=1.414 (deterministic, in-script)
    gain = 1.414
    bound_W = gain * (6.0 / (F_in + F_out)) ** 0.5
    W = jax.random.uniform(k_w, (F_in, F_out), jnp.float32, -bound_W, bound_W)
    bound_a = gain * (6.0 / (2 * F_out + 1)) ** 0.5
    a = jax.random.uniform(k_a, (2 * F_out, 1), jnp.float32, -bound_a, bound_a)

    # adjacency: sparse random 0/1 with self-loops
    adj = (jax.random.uniform(k_adj, (N, N)) > 0.9).astype(jnp.float32)
    adj = jnp.maximum(adj, jnp.eye(N, dtype=jnp.float32))

    ref = gat_reference(h, W, a, adj, alpha=alpha)

    # Exact path: f32 MXU feeds + exact reciprocal (tight tolerance).
    out_exact = jax.block_until_ready(
        gat_forward(h, W, a, adj, alpha=alpha, block_m=128, fast_math=False))
    assert out_exact.shape == (N, F_out)
    assert jnp.allclose(out_exact, ref, atol=1e-4, rtol=1e-4), (
        f"exact path max abs err = {jnp.max(jnp.abs(out_exact - ref))}")

    # Fast path (recommended on v6e/v7x): bf16-fed attn@Wh + approx reciprocal.
    out_fast = jax.block_until_ready(
        gat_forward(h, W, a, adj, alpha=alpha, block_m=128, fast_math=True))
    assert jnp.allclose(out_fast, ref, atol=5e-2, rtol=5e-2), (
        f"fast path max abs err = {jnp.max(jnp.abs(out_fast - ref))}")

    print("KERNEL_OK")
</pallas_src>

<mosaic_0001>
module attributes {stable_mosaic.version = 11 : i64} {
  func.func @gat_kernel(%arg0: i32, %arg1: memref<512x16xf32, #tpu.memory_space<vmem>>, %arg2: memref<16x512xf32, #tpu.memory_space<vmem>>, %arg3: memref<16x128xf32, #tpu.memory_space<vmem>>, %arg4: memref<16x1xf32, #tpu.memory_space<vmem>>, %arg5: memref<1x16xf32, #tpu.memory_space<vmem>>, %arg6: memref<128x512xi8, #tpu.memory_space<vmem>>, %arg7: memref<128x128xf32, #tpu.memory_space<vmem>>) attributes {dimension_semantics = [#tpu.dimension_semantics<parallel>], iteration_bounds = array<i64: 4>, scalar_prefetch = 0 : i64, scratch_operands = 0 : i64, tpu.core_type = #tpu.core_type<tc>, window_params = [{pipeline_mode = #tpu.pipeline_mode<synchronous>, transform_indices = @transform_0, window_bounds = array<i64: 512, 16>}, {pipeline_mode = #tpu.pipeline_mode<synchronous>, transform_indices = @transform_1, window_bounds = array<i64: 16, 512>}, {pipeline_mode = #tpu.pipeline_mode<synchronous>, transform_indices = @transform_2, window_bounds = array<i64: 16, 128>}, {pipeline_mode = #tpu.pipeline_mode<synchronous>, transform_indices = @transform_3, window_bounds = array<i64: 16, 1>}, {pipeline_mode = #tpu.pipeline_mode<synchronous>, transform_indices = @transform_4, window_bounds = array<i64: 1, 16>}, {transform_indices = @transform_5, window_bounds = array<i64: 128, 512>}, {transform_indices = @transform_6, window_bounds = array<i64: 128, 128>}]} {
    %c0 = arith.constant 0 : index
    %c0_0 = arith.constant 0 : index
    %0 = vector.load %arg1[%c0, %c0_0] : memref<512x16xf32, #tpu.memory_space<vmem>>, vector<512x16xf32>
    %c0_1 = arith.constant 0 : index
    %c0_2 = arith.constant 0 : index
    %1 = vector.load %arg3[%c0_1, %c0_2] : memref<16x128xf32, #tpu.memory_space<vmem>>, vector<16x128xf32>
    %cst = arith.constant dense<0.000000e+00> : vector<512x128xf32>
    %2 = tpu.matmul %0, %1, %cst {dimension_numbers = #tpu.dot_dimension_numbers<[1], [0], [0], [1], [0, 0, 1, 1], [], []>} : vector<512x16xf32>, vector<16x128xf32>, vector<512x128xf32> -> vector<512x128xf32>
    %c128_i32 = arith.constant 128 : i32
    %3 = arith.muli %arg0, %c128_i32 : i32
    %4 = tpu.assume_multiple %3, 128 : i32
    %5 = arith.index_cast %4 : i32 to index
    %c0_3 = arith.constant 0 : index
    %6 = vector.load %arg1[%5, %c0_3] : memref<512x16xf32, #tpu.memory_space<vmem>>, vector<128x16xf32>
    %c0_4 = arith.constant 0 : index
    %c0_5 = arith.constant 0 : index
    %7 = vector.load %arg4[%c0_4, %c0_5] : memref<16x1xf32, #tpu.memory_space<vmem>>, vector<16x1xf32>
    %cst_6 = arith.constant dense<0.000000e+00> : vector<128x1xf32>
    %8 = tpu.matmul %6, %7, %cst_6 {dimension_numbers = #tpu.dot_dimension_numbers<[1], [0], [0], [1], [0, 0, 1, 1], [], []>} : vector<128x16xf32>, vector<16x1xf32>, vector<128x1xf32> -> vector<128x1xf32>
    %c0_7 = arith.constant 0 : index
    %c0_8 = arith.constant 0 : index
    %9 = vector.load %arg5[%c0_7, %c0_8] : memref<1x16xf32, #tpu.memory_space<vmem>>, vector<1x16xf32>
    %c0_9 = arith.constant 0 : index
    %c0_10 = arith.constant 0 : index
    %10 = vector.load %arg2[%c0_9, %c0_10] : memref<16x512xf32, #tpu.memory_space<vmem>>, vector<16x512xf32>
    %cst_11 = arith.constant dense<0.000000e+00> : vector<1x512xf32>
    %11 = tpu.matmul %9, %10, %cst_11 {dimension_numbers = #tpu.dot_dimension_numbers<[1], [0], [0], [1], [0, 0, 1, 1], [], []>} : vector<1x16xf32>, vector<16x512xf32>, vector<1x512xf32> -> vector<1x512xf32>
    %12 = vector.broadcast %8 : vector<128x1xf32> to vector<128x512xf32>
    %13 = vector.broadcast %11 : vector<1x512xf32> to vector<128x512xf32>
    %14 = arith.addf %12, %13 : vector<128x512xf32>
    %cst_12 = arith.constant 0.000000e+00 : f32
    %15 = vector.broadcast %cst_12 : f32 to vector<128x512xf32>
    %16 = arith.cmpf ogt, %14, %15 : vector<128x512xf32>
    %cst_13 = arith.constant 2.000000e-01 : f32
    %17 = vector.broadcast %cst_13 : f32 to vector<128x512xf32>
    %18 = arith.mulf %17, %14 : vector<128x512xf32>
    %19 = arith.select %16, %14, %18 : vector<128x512xi1>, vector<128x512xf32>
    %c0_14 = arith.constant 0 : index
    %c0_15 = arith.constant 0 : index
    %20 = vector.load %arg6[%c0_14, %c0_15] : memref<128x512xi8, #tpu.memory_space<vmem>>, vector<128x512xi8>
    %21 = arith.sitofp %20 : vector<128x512xi8> to vector<128x512xf32>
    %cst_16 = arith.constant dense<0xFF800000> : vector<128xf32>
    %22 = vector.multi_reduction <maximumf>, %19, %cst_16 [1] : vector<128x512xf32> to vector<128xf32>
    %23 = vector.shape_cast %22 : vector<128xf32> to vector<128x1xf32>
    %24 = vector.broadcast %23 : vector<128x1xf32> to vector<128x512xf32>
    %25 = arith.subf %19, %24 : vector<128x512xf32>
    %26 = math.exp %25 : vector<128x512xf32>
    %27 = arith.mulf %26, %21 : vector<128x512xf32>
    %cst_17 = arith.constant dense<0.000000e+00> : vector<128xf32>
    %28 = vector.multi_reduction <add>, %27, %cst_17 [1] : vector<128x512xf32> to vector<128xf32>
    %29 = vector.shape_cast %28 : vector<128xf32> to vector<128x1xf32>
    %30 = tpu.reciprocal %29 : vector<128x1xf32> -> vector<128x1xf32>
    %31 = vector.broadcast %30 : vector<128x1xf32> to vector<128x512xf32>
    %32 = arith.mulf %27, %31 : vector<128x512xf32>
    %cst_18 = arith.constant dense<0.000000e+00> : vector<128x128xf32>
    %33 = tpu.matmul %32, %2, %cst_18 {dimension_numbers = #tpu.dot_dimension_numbers<[1], [0], [0], [1], [0, 0, 1, 1], [], []>} : vector<128x512xf32>, vector<512x128xf32>, vector<128x128xf32> -> vector<128x128xf32>
    %cst_19 = arith.constant 0.000000e+00 : f32
    %34 = vector.broadcast %cst_19 : f32 to vector<128x128xf32>
    %35 = arith.cmpf ogt, %33, %34 : vector<128x128xf32>
    %36 = math.exp %33 : vector<128x128xf32>
    %cst_20 = arith.constant 1.000000e+00 : f32
    %37 = vector.broadcast %cst_20 : f32 to vector<128x128xf32>
    %38 = arith.subf %36, %37 : vector<128x128xf32>
    %39 = arith.select %35, %33, %38 : vector<128x128xi1>, vector<128x128xf32>
    %c0_21 = arith.constant 0 : index
    %c0_22 = arith.constant 0 : index
    %40 = vector.load %arg7[%c0_21, %c0_22] : memref<128x128xf32, #tpu.memory_space<vmem>>, vector<128x128xf32>
    tpu.vector_store %arg7[%c0_21, %c0_22], %39 {strides = array<i32>} : memref<128x128xf32, #tpu.memory_space<vmem>>, vector<128x128xf32>,
    return
  }
  func.func @transform_0(%arg0: i32) -> (i32, i32) {
    %c0_i32 = arith.constant 0 : i32
    %c0_i32_0 = arith.constant 0 : i32
    %c0_i32_1 = arith.constant 0 : i32
    return %c0_i32, %c0_i32_0 : i32, i32
  }
  func.func @transform_1(%arg0: i32) -> (i32, i32) {
    %c0_i32 = arith.constant 0 : i32
    %c0_i32_0 = arith.constant 0 : i32
    %c0_i32_1 = arith.constant 0 : i32
    return %c0_i32, %c0_i32_0 : i32, i32
  }
  func.func @transform_2(%arg0: i32) -> (i32, i32) {
    %c0_i32 = arith.constant 0 : i32
    %c0_i32_0 = arith.constant 0 : i32
    %c0_i32_1 = arith.constant 0 : i32
    return %c0_i32, %c0_i32_0 : i32, i32
  }
  func.func @transform_3(%arg0: i32) -> (i32, i32) {
    %c0_i32 = arith.constant 0 : i32
    %c0_i32_0 = arith.constant 0 : i32
    %c0_i32_1 = arith.constant 0 : i32
    return %c0_i32, %c0_i32_0 : i32, i32
  }
  func.func @transform_4(%arg0: i32) -> (i32, i32) {
    %c0_i32 = arith.constant 0 : i32
    %c0_i32_0 = arith.constant 0 : i32
    %c0_i32_1 = arith.constant 0 : i32
    return %c0_i32, %c0_i32_0 : i32, i32
  }
  func.func @transform_5(%arg0: i32) -> (i32, i32) {
    %c0_i32 = arith.constant 0 : i32
    %c0_i32_0 = arith.constant 0 : i32
    return %arg0, %c0_i32 : i32, i32
  }
  func.func @transform_6(%arg0: i32) -> (i32, i32) {
    %c0_i32 = arith.constant 0 : i32
    %c0_i32_0 = arith.constant 0 : i32
    return %arg0, %c0_i32 : i32, i32
  }
}

</mosaic_0001>

<bundles_post_ra>
// kernel: tpu_custom_call.1
= control target key start
LH: loop header
LB: loop body
LE: loop exit
PB: predicated region body
PF: predicated region fallthrough
CT: control target
= control target key end

     0   :  { %11 = vsyncpa [#allocation3], 0  ;;  %s4592_s0 = inlined_call_operand.vmem [shape: f32[512,16], index: 0, kind: input, shape index: {}]   ;;  %s4593_s1 = inlined_call_operand.vmem [shape: f32[16,512], index: 1, kind: input, shape index: {}]   ;;  %s4594_s2 = inlined_call_operand.vmem [shape: f32[16,128], index: 2, kind: input, shape index: {}]   ;;  %s4595_s3 = inlined_call_operand.vmem [shape: f32[16,1], index: 3, kind: input, shape index: {}]   ;;  %s4596_s4 = inlined_call_operand.vmem [shape: f32[1,16], index: 4, kind: input, shape index: {}]   ;;  %s4597_s5 = inlined_call_operand.vmem [shape: s8[512,512], index: 5, kind: input, shape index: {}]   ;;  %s4598_s6 = inlined_call_operand.hbm [shape: f32[512,128], index: 6, kind: output, shape index: {}]  }
   0x1   :  { %13 = vsyncpa [#allocation3 + $0x1], 0  ;;  %s3032_s21 = smov 0   ;;  %s3034_s22 = smov 0  }
   0x2   :  { %s3036_s23 = smov 0   ;;  %s3038_s24 = smov 0  }
   0x3 LB: > { %s3053_s25 = sadd.s32 4294967295, %s2992_s24   ;;  %s2573_s26 = sadd.s32 4294967294, %s2992_s24   ;;  %s2992_s24 = sphi %s3038_s24, %s4745_s24   ;;  %s2988_s23 = sphi %s3036_s23, %s4744_s23   ;;  %s2984_s22 = sphi %s3034_s22, %s4743_s22   ;;  %s2980_s21 = sphi %s3032_s21, %s4742_s21  }
   0x4   : > { %s3057_s27 = sadd.s32 1, %s2992_s24   ;;  %s157_s28 = sadd.s32 1, %s2988_s23 }
   0x5   : > { %s154_s29 = ssub.s32 %s2992_s24, %s3057_s27  ;;  %p167_p0 = scmp.ne.s32.totalorder %s2988_s23, %s2984_s22 }
   0x6   : > { %p155_p1 = scmp.eq.s32.totalorder %s154_s29, 0  ;;  %p168_p2 = scmp.eq.s32.totalorder %s3053_s25, 3 }
   0x7   : > { %p173_p3 = scmp.ne.s32.totalorder %s2984_s22, %s2980_s21  ;;  %p174_p4 = scmp.eq.s32.totalorder %s2573_s26, 3 }
   0x8   : > { %s3068_s30 = scalar_select %p155_p1, %s2988_s23, %s157_s28  }
   0x9   : > { %p3070_p5 = por %p168_p2, %p167_p0  ;;  %p3074_p6 = por %p174_p4, %p173_p3 }
   0xa   : > { %p2576_p7 = scmp.ge.s32.totalorder %s2992_s24, 1  ;;  %p217_p8 = scmp.lt.s32.totalorder %s2992_s24, 5 }
   0xc   : > { %p218_p9 = pnand %p2576_p7, %p217_p8 }
   0xe   : > { %221 = sbr.rel (%p218_p9) target bundleno = 1176 (0x498), region = 44 }
  0x13   : > { %v321_v0 = vld [vmem:[%s4594_s2 + $0x8] sm:$0xff]  ;;  %v320_v1 = vld [vmem:[%s4594_s2] sm:$0xff]  ;;  %vm322_vm0 = vcmask 130048   ;;  %v295_v3 = vld [vmem:[%s4592_s0 + $0x138] sm:$0xff]  ;;  %s2645_s14 = sshll.u32 %s3053_s25, 7  ;;  %s245_s18 = sand.u32 1, %s2984_s22  }
  0x14   : > { %529 = vmatpush.msra.mxu0 %v321_v0  ;;  %2689 = vmatpush.msra.mxu1 %v321_v0  ;;  %v256_v2 = vld [vmem:[%s4592_s0] sm:$0xff]  ;;  %v743_v4 = vld [vmem:[%s4595_s3 + $0x8] sm:$0xff]  ;;  %v302_v5 = vld [vmem:[%s4592_s0 + $0x170] sm:$0xff]  ;;  %s3187_s26 = scalar_lea.vmem %s4592_s0, %s2645_s14  ;;  %s2577_s19 = sshll.u32 %s245_s18, 7 }
  0x15   : > { %2690 = vmatpush.msra.mxu3 %v321_v0  ;;  %v863_v6 = vld [vmem:[%s4593_s1 + $0x28] sm:$0xff]  ;;  %v742_v7 = vld [vmem:[%s4595_s3] sm:$0xff]  ;;  %v303_v10 = vld [vmem:[%s4592_s0 + $0x178] sm:$0xff]  ;;  %s4526_s20 = scalar_lea.vmem [#allocation2], %s2577_s19  ;;  %s2950_s15 = scalar_lea.hbm %s4598_s6, 512 }
  0x16   : > { %530 = vmatpush.msra.mxu0 %v320_v1  ;;  %2691 = vmatpush.msra.mxu1 %v320_v1  ;;  %v257_v8 = vld [vmem:[%s4592_s0 + $0x8] sm:$0xff]  ;;  %v296_v9 = vld [vmem:[%s4592_s0 + $0x140] sm:$0xff]  ;;  %v258_v11 = vld [vmem:[%s4592_s0 + $0x10] sm:$0xff]  ;;  %s2506_s10 = sshll.u32 %s4526_s20, 4  ;;  %s2507_s10 = int_to_ptr.vmem [resolvable:$true] %s2506_s10 }
  0x17   : > { %2581 = vmatmul.msk.f32.vlgmr.msra.gmra.mxu0 %vm322_vm0, %v256_v2  ;;  %2620 = vmatmul.msk.f32.vlgmr.msra.gmra.mxu1 %vm322_vm0, %v295_v3  ;;  %v297_v12 = vld [vmem:[%s4592_s0 + $0x148] sm:$0xff]  ;;  %v304_v13 = vld [vmem:[%s4592_s0 + $0x180] sm:$0xff]  ;;  %v259_v14 = vld [vmem:[%s4592_s0 + $0x18] sm:$0xff] }
  0x18   : > { %806 = vmatpush.msrb.mxu1 %v743_v4  ;;  %2692 = vmatpush.msra.mxu3 %v320_v1  ;;  %v298_v15 = vld [vmem:[%s4592_s0 + $0x150] sm:$0xff]  ;;  %v305_v16 = vld [vmem:[%s4592_s0 + $0x188] sm:$0xff]  ;;  %v260_v17 = vld [vmem:[%s4592_s0 + $0x20] sm:$0xff] }
  0x19   : > { %2627 = vmatmul.msk.f32.vlgmr.msra.gmra.mxu3 %vm322_vm0, %v302_v5  ;;  %v299_v18 = vld [vmem:[%s4592_s0 + $0x158] sm:$0xff]  ;;  %v306_v19 = vld [vmem:[%s4592_s0 + $0x190] sm:$0xff]  ;;  %v261_v20 = vld [vmem:[%s4592_s0 + $0x28] sm:$0xff] }
  0x1a   : > { %903 = vmatpush.msrb.mxu3 %v863_v6  ;;  %807 = vmatpush.msrb.mxu1 %v742_v7  ;;  %v300_v21 = vld [vmem:[%s4592_s0 + $0x160] sm:$0xff]  ;;  %v307_v22 = vld [vmem:[%s4592_s0 + $0x198] sm:$0xff]  ;;  %v262_v23 = vld [vmem:[%s4592_s0 + $0x30] sm:$0xff] }
  0x1b   : > { %v301_v24 = vld [vmem:[%s4592_s0 + $0x168] sm:$0xff]  ;;  %v308_v25 = vld [vmem:[%s4592_s0 + $0x1a0] sm:$0xff]  ;;  %v263_v27 = vld [vmem:[%s4592_s0 + $0x38] sm:$0xff] }
  0x1c   : > { %v859_v26 = vld [vmem:[%s4593_s1 + $0x8] sm:$0xff]  ;;  %v726_v28 = vld [vmem:[%s3187_s26] sm:$0xff]  ;;  %v310_v32 = vld [vmem:[%s4592_s0 + $0x1b0] sm:$0xff] }
  0x1d   : > { %904 = vmatpush.msrb.mxu3 %v859_v26  ;;  %v309_v29 = vld [vmem:[%s4592_s0 + $0x1a8] sm:$0xff]  ;;  %v264_v30 = vld [vmem:[%s4592_s0 + $0x40] sm:$0xff]  ;;  %v728_v34 = vld [vmem:[%s3187_s26 + $0x10] sm:$0xff] }
  0x1e   : > { %v727_v31 = vld [vmem:[%s3187_s26 + $0x8] sm:$0xff]  ;;  %v311_v35 = vld [vmem:[%s4592_s0 + $0x1b8] sm:$0xff]  ;;  %v266_v36 = vld [vmem:[%s4592_s0 + $0x50] sm:$0xff] }
  0x1f   : > { %2582 = vmatmul.msk.f32.gmra.mxu0 %vm322_vm0, %v257_v8  ;;  %2621 = vmatmul.msk.f32.gmra.mxu1 %vm322_vm0, %v296_v9  ;;  %v265_v33 = vld [vmem:[%s4592_s0 + $0x48] sm:$0xff]  ;;  %v729_v37 = vld [vmem:[%s3187_s26 + $0x18] sm:$0xff]  ;;  %v312_v38 = vld [vmem:[%s4592_s0 + $0x1c0] sm:$0xff] }
  0x20   : > { %v267_v39 = vld [vmem:[%s4592_s0 + $0x58] sm:$0xff]  ;;  %v730_v40 = vld [vmem:[%s3187_s26 + $0x20] sm:$0xff]  ;;  %v313_v41 = vld [vmem:[%s4592_s0 + $0x1c8] sm:$0xff] }
  0x21   : > { %2628 = vmatmul.msk.f32.gmra.mxu3 %vm322_vm0, %v303_v10  ;;  %v268_v42 = vld [vmem:[%s4592_s0 + $0x60] sm:$0xff]  ;;  %v731_v43 = vld [vmem:[%s3187_s26 + $0x28] sm:$0xff]  ;;  %v314_v44 = vld [vmem:[%s4592_s0 + $0x1d0] sm:$0xff] }
  0x22   : > { %v269_v45 = vld [vmem:[%s4592_s0 + $0x68] sm:$0xff]  ;;  %v732_v46 = vld [vmem:[%s3187_s26 + $0x30] sm:$0xff]  ;;  %v315_v47 = vld [vmem:[%s4592_s0 + $0x1d8] sm:$0xff] }
  0x23   : > { %v270_v48 = vld [vmem:[%s4592_s0 + $0x70] sm:$0xff]  ;;  %v733_v49 = vld [vmem:[%s3187_s26 + $0x38] sm:$0xff]  ;;  %v316_v50 = vld [vmem:[%s4592_s0 + $0x1e0] sm:$0xff] }
  0x24   : > { %v271_v51 = vld [vmem:[%s4592_s0 + $0x78] sm:$0xff]  ;;  %v734_v52 = vld [vmem:[%s3187_s26 + $0x40] sm:$0xff]  ;;  %v317_v53 = vld [vmem:[%s4592_s0 + $0x1e8] sm:$0xff] }
  0x25   : > { %v862_v54 = vld [vmem:[%s4593_s1 + $0x20] sm:$0xff]  ;;  %v735_v59 = vld [vmem:[%s3187_s26 + $0x48] sm:$0xff]  ;;  %v864_v60 = vld [vmem:[%s4593_s1 + $0x30] sm:$0xff] }
  0x26   : > { %v858_v55 = vld [vmem:[%s4593_s1] sm:$0xff]  ;;  %883 = vmatpush.msra.mxu2 %v862_v54  ;;  %v865_v61 = vld [vmem:[%s4593_s1 + $0x38] sm:$0xff]  ;;  %v318_v62 = vld [vmem:[%s4592_s0 + $0x1f0] sm:$0xff] }
  0x27   : > { %2583 = vmatmul.msk.f32.gmra.mxu0 %vm322_vm0, %v258_v11  ;;  %2622 = vmatmul.msk.f32.gmra.mxu1 %vm322_vm0, %v297_v12  ;;  %v857_v56 = vld [vmem:[%s4596_s4] sm:$0x1]  ;;  %v860_v63 = vld [vmem:[%s4593_s1 + $0x10] sm:$0xff]  ;;  %v861_v0 = vld [vmem:[%s4593_s1 + $0x18] sm:$0xff] }
  0x28   : > { %884 = vmatpush.msra.mxu2 %v858_v55  ;;  %943 = vmatpush.msra.mxu3 %v865_v61  ;;  %v736_v3 = vld [vmem:[%s3187_s26 + $0x50] sm:$0xff]  ;;  %v319_v5 = vld [vmem:[%s4592_s0 + $0x1f8] sm:$0xff]  ;;  %v738_v12 = vld [vmem:[%s3187_s26 + $0x60] sm:$0xff] }
  0x29   : > { %2629 = vmatmul.msk.f32.gmra.mxu3 %vm322_vm0, %v304_v13  ;;  %2662 = vmatmul.msk.f32.vlgmr.msra.gmra.mxu2 %vm322_vm0, %v857_v56  ;;  %v737_v8 = vld [vmem:[%s3187_s26 + $0x58] sm:$0xff]  ;;  %v2994_v13 = vmov 0  }
  0x2a   : > { %923 = vmatpush.msrb.mxu2 %v864_v60  ;;  %944 = vmatpush.msra.mxu3 %v861_v0  ;;  %v275_v60 = vld [vmem:[%s4592_s0 + $0x98] sm:$0xff] }
  0x2b   : > { %2735 = vset.pattern.permute.xlu0 %v2994_v13  ;;  %2736 = vset.pattern.permute.xlu1 %v2994_v13 }
  0x2c   : > { %924 = vmatpush.msrb.mxu2 %v860_v63  ;;  %2737 = vset.pattern.permute.xlu2 %v2994_v13 }
  0x2f   : > { %2584 = vmatmul.msk.f32.gmra.mxu0 %vm322_vm0, %v259_v14  ;;  %2623 = vmatmul.msk.f32.gmra.mxu1 %vm322_vm0, %v298_v15 }
  0x31   : > { %2630 = vmatmul.msk.f32.gmra.mxu3 %vm322_vm0, %v305_v16  ;;  %2664 = vmatmul.msk.f32.vlgmr.msrb.gmra.mxu2 %vm322_vm0, %v857_v56 }
  0x37   : > { %2585 = vmatmul.msk.f32.gmra.mxu0 %vm322_vm0, %v260_v17  ;;  %2624 = vmatmul.msk.f32.gmra.mxu1 %vm322_vm0, %v299_v18  ;;  %v739_v17 = vld [vmem:[%s3187_s26 + $0x68] sm:$0xff] }
  0x39   : > { %2631 = vmatmul.msk.f32.gmra.mxu3 %vm322_vm0, %v306_v19 }
  0x3f   : > { %2586 = vmatmul.msk.f32.gmra.mxu0 %vm322_vm0, %v261_v20  ;;  %2625 = vmatmul.msk.f32.gmra.mxu1 %vm322_vm0, %v300_v21 }
  0x41   : > { %2632 = vmatmul.msk.f32.gmra.mxu3 %vm322_vm0, %v307_v22 }
  0x47   : > { %2587 = vmatmul.msk.f32.gmra.mxu0 %vm322_vm0, %v262_v23  ;;  %2626 = vmatmul.msk.f32.gmra.mxu1 %vm322_vm0, %v301_v24 }
  0x49   : > { %2633 = vmatmul.msk.f32.gmra.mxu3 %vm322_vm0, %v308_v25 }
  0x4f   : > { %2588 = vmatmul.msk.f32.gmra.mxu0 %vm322_vm0, %v263_v27  ;;  %2646 = vmatmul.msk.f32.vlgmr.msrb.gmra.mxu1 %vm322_vm0, %v726_v28 }
  0x51   : > { %2634 = vmatmul.msk.f32.gmra.mxu3 %vm322_vm0, %v309_v29 }
  0x57   : > { %2589 = vmatmul.msk.f32.gmra.mxu0 %vm322_vm0, %v264_v30  ;;  %2647 = vmatmul.msk.f32.gmra.mxu1 %vm322_vm0, %v727_v31 }
  0x59   : > { %2635 = vmatmul.msk.f32.gmra.mxu3 %vm322_vm0, %v310_v32 }
  0x5f   : > { %2590 = vmatmul.msk.f32.gmra.mxu0 %vm322_vm0, %v265_v33  ;;  %2648 = vmatmul.msk.f32.gmra.mxu1 %vm322_vm0, %v728_v34  ;;  %v740_v33 = vld [vmem:[%s3187_s26 + $0x70] sm:$0xff] }
  0x61   : > { %2636 = vmatmul.msk.f32.gmra.mxu3 %vm322_vm0, %v311_v35 }
  0x67   : > { %2591 = vmatmul.msk.f32.gmra.mxu0 %vm322_vm0, %v266_v36  ;;  %2649 = vmatmul.msk.f32.gmra.mxu1 %vm322_vm0, %v729_v37  ;;  %v741_v37 = vld [vmem:[%s3187_s26 + $0x78] sm:$0xff]  ;;  %s2578_s26 = sshll.u32 %s3053_s25, 2  ;;  %s2494_s25 = scalar_lea.sflag [#allocation3], %s245_s18 }
  0x68   : > { %p249_p10 = scmp.lt.s32.totalorder %s2578_s26, 15 }
  0x69   : > { %2637 = vmatmul.msk.f32.gmra.mxu3 %vm322_vm0, %v312_v38 }
  0x6a   : > { %s4747_s26 = smov (!%p249_p10, %s2578_s26), 15 }
  0x6b   : > { %s2687_s13 = sshll.u32 %s4747_s26, 5  ;;  %s2505_s26 = scalar_lea.hbm %s4598_s6, %s2645_s14 }
  0x6c   : > { %s3690_s17 = scalar_lea.vmem %s4597_s5, %s2687_s13  ;;  %s2508_s9 = sshll.u32 %s2505_s26, 4  ;;  %s2509_s9 = int_to_ptr.hbm [resolvable:$true] %s2508_s9 }
  0x6d   : > { %s2944_s11 = sshra.s32 %s2509_s9, 4  ;;  %s2945_s11 = int_to_ptr.hbm [resolvable:$true] %s2944_s11 }
  0x6e   : > { %s2946_s12 = scalar_lea.hbm %s2945_s11, 128  ;;  %p2951_p0 = scmp.lt.s32.totalorder %s2945_s11, %s4598_s6 }
  0x6f   : > { %2592 = vmatmul.msk.f32.gmra.mxu0 %vm322_vm0, %v267_v39  ;;  %2650 = vmatmul.msk.f32.gmra.mxu1 %vm322_vm0, %v730_v40  ;;  %p2947_p11 = scmp.ne.s32.totalorder %s2945_s11, %s2946_s12  ;;  %p2952_p1 = scmp.lt.s32.totalorder %s2950_s15, %s2946_s12 }
  0x71   : > { %2638 = vmatmul.msk.f32.gmra.mxu3 %vm322_vm0, %v313_v41  ;;  %p2948_p12 = pnand %p2947_p11, %p3070_p5  ;;  %p2953_p2 = por %p2952_p1, %p2951_p0 }
  0x73   : > { %p2949_p13 = pneg %p2948_p12 }
  0x75   : > { %p2954_p3 = pnand %p2953_p2, %p2949_p13 }
  0x77   : > { %2593 = vmatmul.msk.f32.gmra.mxu0 %vm322_vm0, %v268_v42  ;;  %2651 = vmatmul.msk.f32.gmra.mxu1 %vm322_vm0, %v731_v43 }
  0x79   : > { %2639 = vmatmul.msk.f32.gmra.mxu3 %vm322_vm0, %v314_v44 }
  0x7f   : > { %2594 = vmatmul.msk.f32.gmra.mxu0 %vm322_vm0, %v269_v45  ;;  %2652 = vmatmul.msk.f32.gmra.mxu1 %vm322_vm0, %v732_v46 }
  0x81   : > { %2640 = vmatmul.msk.f32.gmra.mxu3 %vm322_vm0, %v315_v47 }
  0x87   : > { %2595 = vmatmul.msk.f32.gmra.mxu0 %vm322_vm0, %v270_v48  ;;  %2653 = vmatmul.msk.f32.gmra.mxu1 %vm322_vm0, %v733_v49  ;;  %v272_v48 = vld [vmem:[%s4592_s0 + $0x80] sm:$0xff] }
  0x89   : > { %2641 = vmatmul.msk.f32.gmra.mxu3 %vm322_vm0, %v316_v50 }
  0x8f   : > { %2596 = vmatmul.msk.f32.gmra.mxu0 %vm322_vm0, %v271_v51  ;;  %2654 = vmatmul.msk.f32.gmra.mxu1 %vm322_vm0, %v734_v52  ;;  %v273_v52 = vld [vmem:[%s4592_s0 + $0x88] sm:$0xff] }
  0x91   : > { %2642 = vmatmul.msk.f32.gmra.mxu3 %vm322_vm0, %v317_v53 }
  0x94   : > { %v3290_v57 = vpop.f32.mrf.mxu0  ;;  %v649_v58 = vpop.f32.mrf.mxu1 }
  0x97   : > { %2655 = vmatmul.msk.f32.gmra.mxu1 %vm322_vm0, %v735_v59  ;;  %2597 = vmatmul.msk.f32.gmra.mxu0 %vm322_vm0, %v272_v48 }
  0x99   : > { %2643 = vmatmul.msk.f32.gmra.mxu3 %vm322_vm0, %v318_v62  ;;  %v276_v62 = vld [vmem:[%s4592_s0 + $0xa0] sm:$0xff] }
  0x9c   : > { %v3311_v1 = vpop.f32.mrf.mxu0  ;;  %v652_v2 = vpop.f32.mrf.mxu1 }
  0x9d   : > { %v670_v4 = vpop.f32.mrf.mxu3 }
  0x9f   : > { %2656 = vmatmul.msk.f32.gmra.mxu1 %vm322_vm0, %v736_v3  ;;  %2598 = vmatmul.msk.f32.gmra.mxu0 %vm322_vm0, %v273_v52 }
  0xa1   : > { %2644 = vmatmul.msk.f32.gmra.mxu3 %vm322_vm0, %v319_v5  ;;  %v278_v5 = vld [vmem:[%s4592_s0 + $0xb0] sm:$0xff] }
  0xa4   : > { %v3319_v6 = vpop.f32.mrf.mxu0  ;;  %v655_v7 = vpop.f32.mrf.mxu1 }
  0xa5   : > { %v673_v9 = vpop.f32.mrf.mxu3 }
  0xa6   : > { %2267 = vmatpush.msra.mxu1 %v673_v9 }
  0xa7   : > { %2657 = vmatmul.msk.f32.gmra.mxu1 %vm322_vm0, %v737_v8 }
  0xa8   : > { %2268 = vmatpush.msra.mxu1 %v670_v4 }
  0xa9   : > { %2663 = vmatmul.msk.f32.vlgmr.msrb.gmra.mxu3 %vm322_vm0, %v857_v56 }
  0xac   : > { %v3324_v10 = vpop.f32.mrf.mxu0  ;;  %v658_v11 = vpop.f32.mrf.mxu1 }
  0xad   : > { %v3327_v14 = vpop.f32.mrf.mxu3 }
  0xaf   : > { %2658 = vmatmul.msk.f32.gmra.mxu1 %vm322_vm0, %v738_v12 }
  0xb1   : > { %2665 = vmatmul.msk.f32.vlgmr.msra.gmra.mxu3 %vm322_vm0, %v857_v56  ;;  %v274_v56 = vld [vmem:[%s4592_s0 + $0x90] sm:$0xff] }
  0xb2   : > { %2599 = vmatmul.msk.f32.gmra.mxu0 %vm322_vm0, %v274_v56 }
  0xb4   : > { %v3331_v15 = vpop.f32.mrf.mxu0  ;;  %v661_v16 = vpop.f32.mrf.mxu1 }
  0xb5   : > { %v3334_v18 = vpop.f32.mrf.mxu3 }
  0xb7   : > { %2659 = vmatmul.msk.f32.gmra.mxu1 %vm322_vm0, %v739_v17 }
  0xba   : > { %2600 = vmatmul.msk.f32.gmra.mxu0 %vm322_vm0, %v275_v60 }
  0xbc   : > { %v3337_v19 = vpop.f32.mrf.mxu0  ;;  %v664_v20 = vpop.f32.mrf.mxu1 }
  0xbd   : > { %v3339_v21 = vpop.f32.mrf.mxu3 }
  0xbf   : > { %2660 = vmatmul.msk.f32.gmra.mxu1 %vm322_vm0, %v740_v33 }
  0xc2   : > { %2601 = vmatmul.msk.f32.gmra.mxu0 %vm322_vm0, %v276_v62 }
  0xc4   : > { %v3341_v22 = vpop.f32.mrf.mxu0  ;;  %v667_v23 = vpop.f32.mrf.mxu1 }
  0xc5   : > { %2269 = vmatpush.msra.mxu1 %v667_v23  ;;  %v3343_v24 = vpop.f32.mrf.mxu3 }
  0xc7   : > { %2270 = vmatpush.msra.mxu1 %v664_v20  ;;  %v280_v20 = vld [vmem:[%s4592_s0 + $0xc0] sm:$0xff] }
  0xc8   : > { %2661 = vmatmul.msk.f32.gmra.mxu1 %vm322_vm0, %v741_v37 }
  0xc9   : > { %2271 = vmatpush.msra.mxu1 %v661_v16 }
  0xcb   : > { %2272 = vmatpush.msra.mxu1 %v658_v11 }
  0xcc   : > { %v3345_v25 = vpop.f32.mrf.mxu0  ;;  %v809_v26 = vpop.f32.mrf.mxu1 }
  0xcd   : > { %2273 = vmatpush.msra.mxu1 %v655_v7  ;;  %951 = vperm.xlu0 %2735, %v809_v26   ;;  %v3347_v27 = vpop.f32.mrf.mxu3  ;;  %v886_v7 = vpop.f32.mrf.mxu2 }
  0xce   : > { %v3412_v12 = vperm.slane %v886_v7, 0 }
  0xcf   : > { %2274 = vmatpush.msra.mxu1 %v652_v2  ;;  %v277_v2 = vld [vmem:[%s4592_s0 + $0xa8] sm:$0xff] }
  0xd0   : > { %2602 = vmatmul.msk.f32.gmra.mxu0 %vm322_vm0, %v277_v2 }
  0xd1   : > { %2275 = vmatpush.msra.mxu1 %v649_v58 }
  0xd4   : > { %v556_v28 = vpop.f32.mrf.mxu0  ;;  %v812_v29 = vpop.f32.mrf.mxu1 }
  0xd5   : > { %956 = vperm.xlu0 %2735, %v812_v29   ;;  %v3349_v30 = vpop.f32.mrf.mxu3 }
  0xd8   : > { %2603 = vmatmul.msk.f32.gmra.mxu0 %vm322_vm0, %v278_v5 }
  0xdc   : > { %v559_v31 = vpop.f32.mrf.mxu0  ;;  %v815_v32 = vpop.f32.mrf.mxu1 }
  0xdd   : > { %961 = vperm.xlu1 %2736, %v815_v32   ;;  %v3352_v34 = vpop.f32.mrf.mxu3 }
  0xe4   : > { %v562_v35 = vpop.f32.mrf.mxu0  ;;  %v818_v36 = vpop.f32.mrf.mxu1 }
  0xe5   : > { %966 = vperm.xlu1 %2736, %v818_v36   ;;  %v3356_v38 = vpop.f32.mrf.mxu3 }
  0xec   : > { %v565_v39 = vpop.f32.mrf.mxu0  ;;  %v821_v40 = vpop.f32.mrf.mxu1 }
  0xed   : > { %971 = vperm.xlu2 %2737, %v821_v40   ;;  %v3359_v41 = vpop.f32.mrf.mxu3 }
  0xf4   : > { %v568_v42 = vpop.f32.mrf.mxu0  ;;  %v824_v43 = vpop.f32.mrf.mxu1 }
  0xf5   : > { %976 = vperm.xlu2 %2737, %v824_v43   ;;  %v3361_v44 = vpop.f32.mrf.mxu3 }
  0xfc   : > { %v571_v45 = vpop.f32.mrf.mxu0  ;;  %v827_v46 = vpop.f32.mrf.mxu1 }
  0xfd   : > { %981 = vperm.xlu0 %2735, %v827_v46   ;;  %v706_v47 = vpop.f32.mrf.mxu3 }
 0x104   : > { %v574_v49 = vpop.f32.mrf.mxu0  ;;  %v830_v50 = vpop.f32.mrf.mxu1 }
 0x105   : > { %986 = vperm.xlu2 %2737, %v830_v50   ;;  %v709_v51 = vpop.f32.mrf.mxu3 }
 0x10c   : > { %v577_v53 = vpop.f32.mrf.mxu0  ;;  %v833_v54 = vpop.f32.mrf.mxu1 }
 0x10d   : > { %991 = vperm.xlu2 %2737, %v833_v54   ;;  %2137 = vmatpush.msra.mxu2 %v577_v53  ;;  %v712_v55 = vpop.f32.mrf.mxu3 }
 0x10f   : > { %2138 = vmatpush.msra.mxu2 %v574_v49 }
 0x111   : > { %2139 = vmatpush.msra.mxu2 %v571_v45 }
 0x113   : > { %2140 = vmatpush.msra.mxu2 %v568_v42 }
 0x114   : > { %v836_v58 = vpop.f32.mrf.mxu1 }
 0x115   : > { %996 = vperm.xlu1 %2736, %v836_v58   ;;  %2141 = vmatpush.msra.mxu2 %v565_v39  ;;  %v715_v59 = vpop.f32.mrf.mxu3 }
 0x117   : > { %2142 = vmatpush.msra.mxu2 %v562_v35 }
 0x119   : > { %2143 = vmatpush.msra.mxu2 %v559_v31 }
 0x11b   : > { %2144 = vmatpush.msra.mxu2 %v556_v28 }
 0x11c   : > { %v839_v61 = vpop.f32.mrf.mxu1 }
 0x11d   : > { %1001 = vperm.xlu2 %2737, %v839_v61   ;;  %2145 = vmatpush.msra.mxu2 %v3345_v25  ;;  %v718_v63 = vpop.f32.mrf.mxu3 }
 0x11f   : > { %2146 = vmatpush.msra.mxu2 %v3341_v22 }
 0x121   : > { %2147 = vmatpush.msra.mxu2 %v3337_v19 }
 0x123   : > { %2148 = vmatpush.msra.mxu2 %v3331_v15 }
 0x124   : > { %v3387_v0 = vpop.f32.mrf.mxu1 }
 0x125   : > { %2149 = vmatpush.msra.mxu2 %v3324_v10  ;;  %v721_v3 = vpop.f32.mrf.mxu3 }
 0x127   : > { %2150 = vmatpush.msra.mxu2 %v3319_v6 }
 0x129   : > { %2151 = vmatpush.msra.mxu2 %v3311_v1  ;;  %v926_v1 = vpop.f32.mrf.mxu2 }
 0x12a   : > { %v3408_v10 = vperm.slane %v926_v1, 0 }
 0x12b   : > { %2152 = vmatpush.msra.mxu2 %v3290_v57  ;;  %v279_v57 = vld [vmem:[%s4592_s0 + $0xb8] sm:$0xff] }
 0x12c   : > { %v845_v4 = vpop.f32.mrf.mxu1  ;;  %2604 = vmatmul.msk.f32.gmra.mxu0 %vm322_vm0, %v279_v57 }
 0x12d   : > { %2332 = vmatpush.msrb.mxu2 %v721_v3  ;;  %1011 = vperm.xlu2 %2737, %v845_v4   ;;  %v906_v8 = vpop.f32.mrf.mxu3 }
 0x12e   : > { %v3414_v13 = vperm.slane %v906_v8, 0 }
 0x12f   : > { %2333 = vmatpush.msrb.mxu2 %v718_v63 }
 0x131   : > { %2334 = vmatpush.msrb.mxu2 %v715_v59 }
 0x133   : > { %2335 = vmatpush.msrb.mxu2 %v712_v55 }
 0x134   : > { %v848_v6 = vpop.f32.mrf.mxu1  ;;  %2605 = vmatmul.msk.f32.gmra.mxu0 %vm322_vm0, %v280_v20 }
 0x135   : > { %2336 = vmatpush.msrb.mxu2 %v709_v51  ;;  %1016 = vperm.xlu2 %2737, %v848_v6   ;;  %v946_v9 = vpop.f32.mrf.mxu3  ;;  %v283_v6 = vld [vmem:[%s4592_s0 + $0xd8] sm:$0xff] }
 0x136   : > { %v3410_v11 = vperm.slane %v946_v9, 0 }
 0x137   : > { %2337 = vmatpush.msrb.mxu2 %v706_v47 }
 0x139   : > { %2338 = vmatpush.msrb.mxu2 %v3361_v44 }
 0x13b   : > { %2339 = vmatpush.msrb.mxu2 %v3359_v41 }
 0x13d   : > { %2340 = vmatpush.msrb.mxu2 %v3356_v38 }
 0x13f   : > { %2341 = vmatpush.msrb.mxu2 %v3352_v34  ;;  %v952_v15 = vpop.permute.xlu0 %951 }
 0x140   : > { %v1033_v16 = vadd.f32 %v3412_v12, %v952_v15  ;;  %v1034_v17 = vadd.f32 %v3414_v13, %v952_v15  ;;  %v1035_v19 = vadd.f32 %v3408_v10, %v952_v15  ;;  %v1036_v22 = vadd.f32 %v3410_v11, %v952_v15 }
 0x141   : > { %2342 = vmatpush.msrb.mxu2 %v3349_v30 }
 0x142   : > { %v1161_v23 = vmul.f32 0.2, %v1033_v16  ;;  %v1162_v25 = vmul.f32 0.2, %v1034_v17  ;;  %vm1097_vm1 = vcmp.gt.f32.partialorder %v1033_v16, 0.0  ;;  %vm1098_vm2 = vcmp.gt.f32.partialorder %v1034_v17, 0.0 }
 0x143   : > { %2343 = vmatpush.msrb.mxu2 %v3347_v27  ;;  %vm1099_vm3 = vcmp.gt.f32.partialorder %v1035_v19, 0.0  ;;  %v1163_v26 = vmul.f32 0.2, %v1035_v19  ;;  %v1164_v30 = vmul.f32 0.2, %v1036_v22  ;;  %vm1100_vm4 = vcmp.gt.f32.partialorder %v1036_v22, 0.0 }
 0x144   : > { %v3428_v28 = vsel %vm1097_vm1, %v1033_v16, %v1161_v23  ;;  %v3430_v29 = vsel %vm1098_vm2, %v1034_v17, %v1162_v25  ;;  %v281_v27 = vld [vmem:[%s4592_s0 + $0xc8] sm:$0xff] }
 0x145   : > { %2344 = vmatpush.msrb.mxu2 %v3343_v24  ;;  %v1433_v31 = vmax.f32 %v3428_v28, %v3430_v29  ;;  %v3435_v32 = vsel %vm1099_vm3, %v1035_v19, %v1163_v26  ;;  %v3448_v38 = vsel %vm1100_vm4, %v1036_v22, %v1164_v30  ;;  %2606 = vmatmul.msk.f32.gmra.mxu0 %vm322_vm0, %v281_v27 }
 0x147   : > { %2345 = vmatpush.msrb.mxu2 %v3339_v21  ;;  %v957_v33 = vpop.permute.xlu0 %956  ;;  %v3440_v34 = vpop.permute.xlu2 %971  ;;  %v1434_v24 = vmax.f32 %v1433_v31, %v3435_v32  ;;  %v284_v31 = vld [vmem:[%s4592_s0 + $0xe0] sm:$0xff] }
 0x148   : > { %v1037_v35 = vadd.f32 %v3412_v12, %v957_v33  ;;  %v1038_v36 = vadd.f32 %v3414_v13, %v957_v33  ;;  %v1039_v37 = vadd.f32 %v3408_v10, %v957_v33  ;;  %v1040_v21 = vadd.f32 %v3410_v11, %v957_v33 }
 0x149   : > { %2346 = vmatpush.msrb.mxu2 %v3334_v18  ;;  %v1435_v41 = vmax.f32 %v1434_v24, %v3448_v38 }
 0x14a   : > { %v1165_v39 = vmul.f32 0.2, %v1037_v35  ;;  %v1166_v40 = vmul.f32 0.2, %v1038_v36  ;;  %vm1101_vm5 = vcmp.gt.f32.partialorder %v1037_v35, 0.0  ;;  %vm1102_vm6 = vcmp.gt.f32.partialorder %v1038_v36, 0.0 }
 0x14b   : > { %2347 = vmatpush.msrb.mxu2 %v3327_v14  ;;  %1436 = vmax.xlane.f32.xlu1 %v1435_v41  ;;  %v1167_v42 = vmul.f32 0.2, %v1039_v37  ;;  %v1168_v43 = vmul.f32 0.2, %v1040_v21  ;;  %vm1103_vm7 = vcmp.gt.f32.partialorder %v1039_v37, 0.0  ;;  %vm1104_vm8 = vcmp.gt.f32.partialorder %v1040_v21, 0.0 }
 0x14c   : > { %v3453_v44 = vsel %vm1101_vm5, %v1037_v35, %v1165_v39  ;;  %v3455_v18 = vsel %vm1102_vm6, %v1038_v36, %v1166_v40  ;;  %v282_v14 = vld [vmem:[%s4592_s0 + $0xd0] sm:$0xff] }
 0x14d   : > { %v1438_v45 = vmax.f32 %v3453_v44, %v3455_v18  ;;  %v3463_v49 = vsel %vm1103_vm7, %v1039_v37, %v1167_v42  ;;  %v3465_v50 = vsel %vm1104_vm8, %v1040_v21, %v1168_v43  ;;  %2607 = vmatmul.msk.f32.gmra.mxu0 %vm322_vm0, %v282_v14  ;;  %v285_v14 = vld [vmem:[%s4592_s0 + $0xe8] sm:$0xff] }
 0x14f   : > { %v962_v46 = vpop.permute.xlu1 %961  ;;  %v977_v47 = vpop.permute.xlu2 %976  ;;  %v1439_v59 = vmax.f32 %v1438_v45, %v3463_v49 }
 0x150   : > { %v1041_v48 = vadd.f32 %v3412_v12, %v962_v46  ;;  %v1042_v51 = vadd.f32 %v3414_v13, %v962_v46  ;;  %v1053_v52 = vadd.f32 %v3412_v12, %v977_v47  ;;  %v1054_v53 = vadd.f32 %v3414_v13, %v977_v47 }
 0x151   : > { %v1055_v54 = vadd.f32 %v3408_v10, %v977_v47  ;;  %v1043_v55 = vadd.f32 %v3408_v10, %v962_v46  ;;  %v1056_v58 = vadd.f32 %v3410_v11, %v977_v47  ;;  %v1044_v62 = vadd.f32 %v3410_v11, %v962_v46 }
 0x152   : > { %v1169_v56 = vmul.f32 0.2, %v1041_v48  ;;  %v1181_v60 = vmul.f32 0.2, %v1053_v52  ;;  %v1182_v61 = vmul.f32 0.2, %v1054_v53  ;;  %v1440_v63 = vmax.f32 %v1439_v59, %v3465_v50 }
 0x153   : > { %vm1117_vm9 = vcmp.gt.f32.partialorder %v1053_v52, 0.0  ;;  %vm1118_vm10 = vcmp.gt.f32.partialorder %v1054_v53, 0.0  ;;  %v1183_v2 = vmul.f32 0.2, %v1055_v54  ;;  %vm1105_vm11 = vcmp.gt.f32.partialorder %v1041_v48, 0.0 }
 0x154   : > { %v1170_v3 = vmul.f32 0.2, %v1042_v51  ;;  %vm1119_vm12 = vcmp.gt.f32.partialorder %v1055_v54, 0.0  ;;  %v3477_v4 = vsel %vm1117_vm9, %v1053_v52, %v1181_v60  ;;  %v3479_v5 = vsel %vm1118_vm10, %v1054_v53, %v1182_v61  ;;  %1441 = vmax.xlane.f32.xlu0 %v1440_v63  ;;  %v3534_v52 = vpop.f32.mrf.mxu1  ;;  %v287_v53 = vld [vmem:[%s4592_s0 + $0xf8] sm:$0xff] }
 0x155   : > { %v1184_v7 = vmul.f32 0.2, %v1056_v58  ;;  %v1458_v8 = vmax.f32 %v3477_v4, %v3479_v5  ;;  %vm1106_vm13 = vcmp.gt.f32.partialorder %v1042_v51, 0.0  ;;  %vm1120_vm14 = vcmp.gt.f32.partialorder %v1056_v58, 0.0  ;;  %2608 = vmatmul.msk.f32.gmra.mxu0 %vm322_vm0, %v283_v6 }
 0x156   : > { %v1171_v57 = vmul.f32 0.2, %v1043_v55  ;;  %v3486_v1 = vsel %vm1105_vm11, %v1041_v48, %v1169_v56  ;;  %v3488_v9 = vsel %vm1119_vm12, %v1055_v54, %v1183_v2  ;;  %vm1107_vm15 = vcmp.gt.f32.partialorder %v1043_v55, 0.0  ;;  %v289_v2 = vld [vmem:[%s4592_s0 + $0x108] sm:$0xff] }
 0x157   : > { %v1459_v15 = vmax.f32 %v1458_v8, %v3488_v9  ;;  %v1172_v16 = vmul.f32 0.2, %v1044_v62  ;;  %v3491_v17 = vsel %vm1106_vm13, %v1042_v51, %v1170_v3  ;;  %v3494_v19 = vsel %vm1120_vm14, %v1056_v58, %v1184_v7  ;;  %v286_v51 = vld [vmem:[%s4592_s0 + $0xf0] sm:$0xff]  ;;  %v967_v54 = vpop.permute.xlu1 %966 }
 0x158   : > { %vm1108_vm1 = vcmp.gt.f32.partialorder %v1044_v62, 0.0  ;;  %v1443_v20 = vmax.f32 %v3486_v1, %v3491_v17  ;;  %v3499_v23 = vsel %vm1107_vm15, %v1043_v55, %v1171_v57  ;;  %v3540_v55 = vpop.f32.mrf.mxu0  ;;  %v1045_v56 = vadd.f32 %v3412_v12, %v967_v54 }
 0x159   : > { %v1460_v22 = vmax.f32 %v1459_v15, %v3494_v19  ;;  %v3502_v26 = vsel %vm1108_vm1, %v1044_v62, %v1172_v16  ;;  %4649 = vst [vmem:[#allocation7_spill] sm:$0xff] %v3540_v55  ;;  %v1046_v58 = vadd.f32 %v3414_v13, %v967_v54  ;;  %v1047_v63 = vadd.f32 %v3408_v10, %v967_v54 }
 0x15a   : > { %v1444_v25 = vmax.f32 %v1443_v20, %v3499_v23  ;;  %v1173_v60 = vmul.f32 0.2, %v1045_v56  ;;  %vm1109_vm6 = vcmp.gt.f32.partialorder %v1045_v56, 0.0  ;;  %v1049_v3 = vadd.f32 %v3412_v12, %v3440_v34 }
 0x15b   : > { %1461 = vmax.xlane.f32.xlu1 %v1460_v22  ;;  %v1174_v61 = vmul.f32 0.2, %v1046_v58  ;;  %vm1110_vm7 = vcmp.gt.f32.partialorder %v1046_v58, 0.0  ;;  %v1050_v7 = vadd.f32 %v3414_v13, %v3440_v34  ;;  %v1048_v57 = vadd.f32 %v3410_v11, %v967_v54 }
 0x15c   : > { %v1445_v30 = vmax.f32 %v1444_v25, %v3502_v26  ;;  %v854_v59 = vpop.f32.mrf.mxu1  ;;  %v3558_v8 = vsel %vm1109_vm6, %v1045_v56, %v1173_v60  ;;  %v1175_v15 = vmul.f32 0.2, %v1047_v63  ;;  %vm1111_vm8 = vcmp.gt.f32.partialorder %v1047_v63, 0.0  ;;  %v291_v60 = vld [vmem:[%s4592_s0 + $0x118] sm:$0xff] }
 0x15d   : > { %2609 = vmatmul.msk.f32.gmra.mxu0 %vm322_vm0, %v284_v31  ;;  %v3560_v6 = vsel %vm1110_vm7, %v1046_v58, %v1174_v61  ;;  %v1177_v20 = vmul.f32 0.2, %v1049_v3  ;;  %v1178_v22 = vmul.f32 0.2, %v1050_v7  ;;  %vm1113_vm9 = vcmp.gt.f32.partialorder %v1049_v3, 0.0 }
 0x15e   : > { %1446 = vmax.xlane.f32.xlu2 %v1445_v30  ;;  %v1448_v16 = vmax.f32 %v3558_v8, %v3560_v6  ;;  %vm1114_vm10 = vcmp.gt.f32.partialorder %v1050_v7, 0.0  ;;  %v1051_v31 = vadd.f32 %v3408_v10, %v3440_v34  ;;  %vm1112_vm11 = vcmp.gt.f32.partialorder %v1048_v57, 0.0 }
 0x15f   : > { %v987_v27 = vpop.permute.xlu2 %986 }
 0x160   : > { %v1061_v33 = vadd.f32 %v3412_v12, %v987_v27  ;;  %v1062_v24 = vadd.f32 %v3414_v13, %v987_v27  ;;  %v1063_v35 = vadd.f32 %v3408_v10, %v987_v27  ;;  %v1064_v36 = vadd.f32 %v3410_v11, %v987_v27  ;;  %v3548_v62 = vpop.f32.mrf.mxu0 }
 0x161   : > { %v1176_v27 = vmul.f32 0.2, %v1048_v57  ;;  %vm1115_vm12 = vcmp.gt.f32.partialorder %v1051_v31, 0.0 }
 0x162   : > { %v1189_v37 = vmul.f32 0.2, %v1061_v33  ;;  %v1190_v21 = vmul.f32 0.2, %v1062_v24  ;;  %vm1125_vm2 = vcmp.gt.f32.partialorder %v1061_v33, 0.0  ;;  %vm1126_vm3 = vcmp.gt.f32.partialorder %v1062_v24, 0.0 }
 0x163   : > { %vm1127_vm4 = vcmp.gt.f32.partialorder %v1063_v35, 0.0  ;;  %v1191_v39 = vmul.f32 0.2, %v1063_v35  ;;  %v1192_v40 = vmul.f32 0.2, %v1064_v36  ;;  %vm1128_vm5 = vcmp.gt.f32.partialorder %v1064_v36, 0.0 }
 0x164   : > { %v3513_v41 = vsel %vm1125_vm2, %v1061_v33, %v1189_v37  ;;  %v3515_v42 = vsel %vm1126_vm3, %v1062_v24, %v1190_v21  ;;  %v3570_v33 = vsel %vm1111_vm8, %v1047_v63, %v1175_v15  ;;  %v3578_v21 = vsel %vm1113_vm9, %v1049_v3, %v1177_v20 }
 0x165   : > { %v1468_v43 = vmax.f32 %v3513_v41, %v3515_v42  ;;  %v3519_v45 = vsel %vm1127_vm4, %v1063_v35, %v1191_v39  ;;  %v3525_v47 = vsel %vm1128_vm5, %v1064_v36, %v1192_v40  ;;  %2610 = vmatmul.msk.f32.gmra.mxu0 %vm322_vm0, %v285_v14  ;;  %v1449_v24 = vmax.f32 %v1448_v16, %v3570_v33  ;;  %v290_v35 = vld [vmem:[%s4592_s0 + $0x110] sm:$0xff] }
 0x166   : > { %4647 = vst [vmem:[#allocation5_spill] sm:$0xff] %v3519_v45  ;;  %v3580_v39 = vsel %vm1114_vm10, %v1050_v7, %v1178_v22  ;;  %v1052_v40 = vadd.f32 %v3410_v11, %v3440_v34  ;;  %v1179_v14 = vmul.f32 0.2, %v1051_v31 }
 0x167   : > { %v1469_v46 = vmax.f32 %v1468_v43, %v3519_v45  ;;  %4648 = vst [vmem:[#allocation6_spill] sm:$0xff] %v3525_v47  ;;  %v3584_v43 = vsel %vm1112_vm11, %v1048_v57, %v1176_v27  ;;  %v992_v54 = vpop.permute.xlu2 %991 }
 0x168   : > { %1006 = vperm.xlu0 %2735, %v3387_v0   ;;  %v288_v0 = vld [vmem:[%s4592_s0 + $0x100] sm:$0xff]  ;;  %v3566_v30 = vpop.f32.mrf.mxu0  ;;  %v1180_v56 = vmul.f32 0.2, %v1052_v40  ;;  %v3593_v58 = vsel %vm1115_vm12, %v1051_v31, %v1179_v14  ;;  %vm1116_vm15 = vcmp.gt.f32.partialorder %v1052_v40, 0.0  ;;  %v1065_v61 = vadd.f32 %v3412_v12, %v992_v54 }
 0x169   : > { %v1470_v48 = vmax.f32 %v1469_v46, %v3525_v47  ;;  %v1450_v46 = vmax.f32 %v1449_v24, %v3584_v43  ;;  %v1066_v63 = vadd.f32 %v3414_v13, %v992_v54  ;;  %v1067_v24 = vadd.f32 %v3408_v10, %v992_v54 }
 0x16a   : > { %v3606_v57 = vsel %vm1116_vm15, %v1052_v40, %v1180_v56  ;;  %v1193_v22 = vmul.f32 0.2, %v1065_v61  ;;  %vm1129_vm2 = vcmp.gt.f32.partialorder %v1065_v61, 0.0 }
 0x16b   : > { %1471 = vmax.xlane.f32.xlu2 %v1470_v48  ;;  %v1453_v48 = vmax.f32 %v3578_v21, %v3580_v39  ;;  %v1194_v31 = vmul.f32 0.2, %v1066_v63  ;;  %vm1130_vm3 = vcmp.gt.f32.partialorder %v1066_v63, 0.0  ;;  %v1195_v56 = vmul.f32 0.2, %v1067_v24 }
 0x16c   : > { %vm1131_vm5 = vcmp.gt.f32.partialorder %v1067_v24, 0.0 }
 0x16d   : > { %2611 = vmatmul.msk.f32.gmra.mxu0 %vm322_vm0, %v286_v51 }
 0x16f   : > { %v982_v25 = vpop.permute.xlu0 %981 }
 0x170   : > { %v1057_v36 = vadd.f32 %v3412_v12, %v982_v25  ;;  %v1058_v37 = vadd.f32 %v3414_v13, %v982_v25  ;;  %v1059_v34 = vadd.f32 %v3408_v10, %v982_v25  ;;  %v1060_v7 = vadd.f32 %v3410_v11, %v982_v25 }
 0x172   : > { %v1185_v51 = vmul.f32 0.2, %v1057_v36  ;;  %vm1121_vm13 = vcmp.gt.f32.partialorder %v1057_v36, 0.0  ;;  %vm1122_vm14 = vcmp.gt.f32.partialorder %v1058_v37, 0.0  ;;  %v1187_v15 = vmul.f32 0.2, %v1059_v34 }
 0x173   : > { %vm1123_vm1 = vcmp.gt.f32.partialorder %v1059_v34, 0.0  ;;  %v1188_v25 = vmul.f32 0.2, %v1060_v7  ;;  %vm1124_vm4 = vcmp.gt.f32.partialorder %v1060_v7, 0.0 }
 0x175   : > { %2612 = vmatmul.msk.f32.gmra.mxu0 %vm322_vm0, %v287_v53  ;;  %v1186_v53 = vmul.f32 0.2, %v1058_v37 }
 0x177   : > { %v3603_v3 = vsel %vm1122_vm14, %v1058_v37, %v1186_v53  ;;  %v1002_v27 = vpop.permute.xlu2 %1001  ;;  %v3625_v53 = vsel %vm1124_vm4, %v1060_v7, %v1188_v25 }
 0x178   : > { %v1073_v40 = vadd.f32 %v3412_v12, %v1002_v27  ;;  %v1074_v14 = vadd.f32 %v3414_v13, %v1002_v27  ;;  %4652 = vst [vmem:[#allocation10_spill] sm:$0xff] %v3625_v53 }
 0x17a   : > { %vm1137_vm6 = vcmp.gt.f32.partialorder %v1073_v40, 0.0  ;;  %vm1138_vm7 = vcmp.gt.f32.partialorder %v1074_v14, 0.0 }
 0x17d   : > { %2613 = vmatmul.msk.f32.gmra.mxu0 %vm322_vm0, %v288_v0  ;;  %v3590_v0 = vpop.f32.mrf.mxu0 }
 0x183   : > { %1026 = vperm.xlu2 %2737, %v854_v59   ;;  %v1454_v59 = vmax.f32 %v1453_v48, %v3593_v58  ;;  %v3622_v48 = vsel %vm1130_vm3, %v1066_v63, %v1194_v31 }
 0x184   : > { %4651 = vst [vmem:[#allocation9_spill] sm:$0xff] %v3622_v48 }
 0x185   : > { %2614 = vmatmul.msk.f32.gmra.mxu0 %vm322_vm0, %v289_v2  ;;  %v3601_v2 = vsel %vm1121_vm13, %v1057_v36, %v1185_v51  ;;  %v1455_v16 = vmax.f32 %v1454_v59, %v3606_v57  ;;  %v3616_v37 = vpop.f32.mrf.mxu0  ;;  %v1068_v51 = vadd.f32 %v3410_v11, %v992_v54 }
 0x186   : > { %v1463_v20 = vmax.f32 %v3601_v2, %v3603_v3 }
 0x187   : > { %v1196_v63 = vmul.f32 0.2, %v1068_v51  ;;  %vm1132_vm8 = vcmp.gt.f32.partialorder %v1068_v51, 0.0 }
 0x18d   : > { %2615 = vmatmul.msk.f32.gmra.mxu0 %vm322_vm0, %v290_v35  ;;  %v3613_v35 = vsel %vm1123_vm1, %v1059_v34, %v1187_v15  ;;  %v1202_v15 = vmul.f32 0.2, %v1074_v14 }
 0x18e   : > { %v1464_v36 = vmax.f32 %v1463_v20, %v3613_v35  ;;  %v3631_v20 = vsel %vm1131_vm5, %v1067_v24, %v1195_v56  ;;  %v1076_v24 = vadd.f32 %v3410_v11, %v1002_v27  ;;  %v3647_v56 = vsel %vm1132_vm8, %v1068_v51, %v1196_v63 }
 0x18f   : > { %4653 = vst [vmem:[#allocation11_spill] sm:$0xff] %v3631_v20  ;;  %v3638_v25 = vsel %vm1138_vm7, %v1074_v14, %v1202_v15 }
 0x190   : > { %v1465_v34 = vmax.f32 %v1464_v36, %v3625_v53  ;;  %4655 = vst [vmem:[#allocation13_spill] sm:$0xff] %v3638_v25  ;;  %v292_v36 = vld [vmem:[%s4592_s0 + $0x120] sm:$0xff]  ;;  %vm1140_vm12 = vcmp.gt.f32.partialorder %v1076_v24, 0.0 }
 0x191   : > { %4656 = vst [vmem:[#allocation14_spill] sm:$0xff] %v3647_v56 }
 0x192   : > { %1451 = vmax.xlane.f32.xlu0 %v1450_v46  ;;  %v3620_v46 = vsel %vm1129_vm2, %v1065_v61, %v1193_v22  ;;  %v1075_v61 = vadd.f32 %v3408_v10, %v1002_v27 }
 0x193   : > { %4650 = vst [vmem:[#allocation8_spill] sm:$0xff] %v3620_v46  ;;  %v1473_v59 = vmax.f32 %v3620_v46, %v3622_v48 }
 0x194   : > { %vm1139_vm9 = vcmp.gt.f32.partialorder %v1075_v61, 0.0 }
 0x195   : > { %2616 = vmatmul.msk.f32.gmra.mxu0 %vm322_vm0, %v291_v60  ;;  %v1201_v60 = vmul.f32 0.2, %v1073_v40  ;;  %v1474_v54 = vmax.f32 %v1473_v59, %v3631_v20  ;;  %v1203_v59 = vmul.f32 0.2, %v1075_v61 }
 0x197   : > { %v3636_v31 = vsel %vm1137_vm6, %v1073_v40, %v1201_v60  ;;  %v1475_v47 = vmax.f32 %v1474_v54, %v3647_v56  ;;  %v3653_v45 = vsel %vm1139_vm9, %v1075_v61, %v1203_v59 }
 0x198   : > { %4654 = vst [vmem:[#allocation12_spill] sm:$0xff] %v3636_v31  ;;  %v1483_v40 = vmax.f32 %v3636_v31, %v3638_v25  ;;  %v293_v31 = vld [vmem:[%s4592_s0 + $0x128] sm:$0xff] }
 0x199   : > { %4657 = vst [vmem:[#allocation15_spill] sm:$0xff] %v3653_v45 }
 0x19a   : > { %1456 = vmax.xlane.f32.xlu0 %v1455_v16  ;;  %v1012_v16 = vpop.permute.xlu2 %1011  ;;  %v1484_v27 = vmax.f32 %v1483_v40, %v3653_v45  ;;  %v3676_v40 = vpop.permute.xlu1 %996 }
 0x19b   : > { %v1081_v7 = vadd.f32 %v3412_v12, %v1012_v16  ;;  %v1082_v22 = vadd.f32 %v3414_v13, %v1012_v16  ;;  %v1083_v15 = vadd.f32 %v3408_v10, %v1012_v16  ;;  %v1084_v54 = vadd.f32 %v3410_v11, %v1012_v16 }
 0x19d   : > { %2617 = vmatmul.msk.f32.gmra.mxu0 %vm322_vm0, %v292_v36  ;;  %v1209_v14 = vmul.f32 0.2, %v1081_v7  ;;  %v1210_v60 = vmul.f32 0.2, %v1082_v22  ;;  %vm1145_vm10 = vcmp.gt.f32.partialorder %v1081_v7, 0.0  ;;  %vm1146_vm11 = vcmp.gt.f32.partialorder %v1082_v22, 0.0 }
 0x19e   : > { %v1204_v36 = vmul.f32 0.2, %v1076_v24  ;;  %vm1147_vm13 = vcmp.gt.f32.partialorder %v1083_v15, 0.0  ;;  %v1212_v16 = vmul.f32 0.2, %v1084_v54  ;;  %vm1148_vm14 = vcmp.gt.f32.partialorder %v1084_v54, 0.0 }
 0x19f   : > { %v3656_v51 = vsel %vm1145_vm10, %v1081_v7, %v1209_v14  ;;  %v3658_v63 = vsel %vm1146_vm11, %v1082_v22, %v1210_v60  ;;  %v294_v14 = vld [vmem:[%s4592_s0 + $0x130] sm:$0xff] }
 0x1a0   : > { %4658 = vst [vmem:[#allocation16_spill] sm:$0xff] %v3656_v51  ;;  %v3662_v25 = vsel %vm1140_vm12, %v1076_v24, %v1204_v36  ;;  %v1493_v59 = vmax.f32 %v3656_v51, %v3658_v63  ;;  %v3681_v60 = vsel %vm1148_vm14, %v1084_v54, %v1212_v16  ;;  %v3700_v16 = vld [vmem:[%s3690_s17 + $0x8] sm:$0xff] }
 0x1a1   : > { %4659 = vst [vmem:[#allocation17_spill] sm:$0xff] %v3658_v63  ;;  %v1485_v61 = vmax.f32 %v1484_v27, %v3662_v25 }
 0x1a2   : > { %1466 = vmax.xlane.f32.xlu0 %v1465_v34  ;;  %v3644_v34 = vpop.f32.mrf.mxu0  ;;  %4660 = vst [vmem:[#allocation18_spill] sm:$0xff] %v3662_v25  ;;  %v3717_v20 = vpop.permute.xlu2 %1016 }
 0x1a3   : > { %4662 = vst [vmem:[#allocation20_spill] sm:$0xff] %v3681_v60 }
 0x1a5   : > { %2618 = vmatmul.msk.f32.gmra.mxu0 %vm322_vm0, %v293_v31 }
 0x1aa   : > { %1476 = vmax.xlane.f32.xlu0 %v1475_v47  ;;  %v1211_v47 = vmul.f32 0.2, %v1083_v15  ;;  %v3671_v7 = vpop.f32.mrf.mxu0 }
 0x1ac   : > { %v3673_v22 = vsel %vm1147_vm13, %v1083_v15, %v1211_v47 }
 0x1ad   : > { %4661 = vst [vmem:[#allocation19_spill] sm:$0xff] %v3673_v22  ;;  %v1494_v24 = vmax.f32 %v1493_v59, %v3673_v22  ;;  %2619 = vmatmul.msk.f32.gmra.mxu0 %vm322_vm0, %v294_v14  ;;  %v3697_v59 = vld [vmem:[%s3690_s17] sm:$0xff]  ;;  %v3703_v22 = vld [vmem:[%s3690_s17 + $0x10] sm:$0xff] }
 0x1ae   : > { %v1305_v63 = vunpack.c.0.s8 %v3697_v59 }
 0x1af   : > { %v1495_v31 = vmax.f32 %v1494_v24, %v3681_v60 }
 0x1b2   : > { %1486 = vmax.xlane.f32.xlu0 %v1485_v61  ;;  %v3685_v15 = vpop.f32.mrf.mxu0 }
 0x1ba   : > { %1496 = vmax.xlane.f32.xlu0 %v1495_v31 }
 0x1be   : > { %v1437_v36 = vpop.xlane.xlu1 %1436 }
 0x1bf   : > { %v1513_v27 = vsub.f32 %v3428_v28, %v1437_v36  ;;  %v1514_v54 = vsub.f32 %v3430_v29, %v1437_v36  ;;  %v1515_v47 = vsub.f32 %v3435_v32, %v1437_v36  ;;  %v1516_v61 = vsub.f32 %v3448_v38, %v1437_v36  ;;  %v3707_v28 = vld [vmem:[%s3690_s17 + $0x18] sm:$0xff]  ;;  %v3710_v32 = vpop.f32.mrf.mxu0 }
 0x1c0   : > { %v1306_v29 = vunpack.c.0.s8 %v3700_v16  ;;  %v1307_v38 = vunpack.c.0.s8 %v3703_v22  ;;  %v1308_v36 = vunpack.c.0.s8 %v3707_v28 }
 0x1c1   : > { %v1577_v24 = vmul.f32 1.442695, %v1513_v27  ;;  %v1579_v14 = vmul.f32 1.442695, %v1514_v54  ;;  %v1581_v31 = vmul.f32 1.442695, %v1515_v47  ;;  %v1369_v27 = vcvt.s32.f32 %v1305_v63 }
 0x1c2   : > { %v1583_v60 = vmul.f32 1.442695, %v1516_v61  ;;  %v1370_v54 = vcvt.s32.f32 %v1306_v29  ;;  %v1371_v45 = vcvt.s32.f32 %v1307_v38 }
 0x1c3   : > { %2738 = vpow2.f32 %v1577_v24 }
 0x1c4   : > { %2740 = vpow2.f32 %v1579_v14 }
 0x1c5   : > { %2742 = vpow2.f32 %v1581_v31  ;;  %v1372_v31 = vcvt.s32.f32 %v1308_v36 }
 0x1c6   : > { %2744 = vpow2.f32 %v1583_v60 }
 0x1c7   : > { %v1442_v47 = vpop.xlane.xlu0 %1441 }
 0x1c8   : > { %v1517_v51 = vsub.f32 %v3453_v44, %v1442_v47  ;;  %v1518_v24 = vsub.f32 %v3455_v18, %v1442_v47  ;;  %v1519_v25 = vsub.f32 %v3463_v49, %v1442_v47  ;;  %v1520_v14 = vsub.f32 %v3465_v50, %v1442_v47  ;;  %v3724_v44 = vpop.f32.mrf.mxu0 }
 0x1c9   : > { %v2739_v61 = vpop.eup %2738  ;;  %v1309_v49 = vunpack.c.1.s8 %v3697_v59 }
 0x1ca   : > { %v2741_v56 = vpop.eup %2740  ;;  %v3720_v60 = vmul.f32 %v2739_v61, %v1369_v27  ;;  %v1585_v63 = vmul.f32 1.442695, %v1517_v51  ;;  %v1587_v29 = vmul.f32 1.442695, %v1518_v24  ;;  %v1589_v46 = vmul.f32 1.442695, %v1519_v25 }
 0x1cb   : > { %v2743_v48 = vpop.eup %2742  ;;  %v3722_v53 = vmul.f32 %v2741_v56, %v1370_v54  ;;  %v1591_v36 = vmul.f32 1.442695, %v1520_v14  ;;  %v1310_v27 = vunpack.c.1.s8 %v3700_v16  ;;  %v1311_v56 = vunpack.c.1.s8 %v3703_v22 }
 0x1cc   : > { %4663 = vst [vmem:[#allocation21_spill] sm:$0xff] %v3720_v60  ;;  %v2745_v18 = vpop.eup %2744  ;;  %2746 = vpow2.f32 %v1585_v63  ;;  %v3727_v38 = vmul.f32 %v2743_v48, %v1371_v45  ;;  %v1373_v54 = vcvt.s32.f32 %v1309_v49 }
 0x1cd   : > { %4664 = vst [vmem:[#allocation22_spill] sm:$0xff] %v3722_v53  ;;  %v1769_v50 = vadd.f32 %v3722_v53, %v3720_v60  ;;  %2748 = vpow2.f32 %v1587_v29  ;;  %v3732_v51 = vmul.f32 %v2745_v18, %v1372_v31  ;;  %v1374_v48 = vcvt.s32.f32 %v1310_v27 }
 0x1ce   : > { %4665 = vst [vmem:[#allocation23_spill] sm:$0xff] %v3727_v38  ;;  %2750 = vpow2.f32 %v1589_v46  ;;  %v1312_v46 = vunpack.c.1.s8 %v3707_v28  ;;  %v1375_v18 = vcvt.s32.f32 %v1311_v56 }
 0x1cf   : > { %4666 = vst [vmem:[#allocation24_spill] sm:$0xff] %v3732_v51  ;;  %v1770_v25 = vadd.f32 %v1769_v50, %v3727_v38  ;;  %2752 = vpow2.f32 %v1591_v36 }
 0x1d0   : > { %v3740_v31 = vpop.f32.mrf.mxu0 }
 0x1d1   : > { %v1771_v47 = vadd.f32 %v1770_v25, %v3732_v51  ;;  %v1447_v45 = vpop.xlane.xlu2 %1446 }
 0x1d2   : > { %v2747_v61 = vpop.eup %2746  ;;  %v1521_v24 = vsub.f32 %v3486_v1, %v1447_v45  ;;  %v1522_v14 = vsub.f32 %v3491_v17, %v1447_v45  ;;  %v1523_v29 = vsub.f32 %v3499_v23, %v1447_v45  ;;  %v1524_v27 = vsub.f32 %v3502_v26, %v1447_v45 }
 0x1d3   : > { %1772 = vadd.xlane.f32.xlu1 %v1771_v47  ;;  %v2749_v63 = vpop.eup %2748  ;;  %v3743_v49 = vmul.f32 %v2747_v61, %v1373_v54  ;;  %v1376_v1 = vcvt.s32.f32 %v1312_v46  ;;  %v1313_v23 = vunpack.c.2.s8 %v3697_v59  ;;  %v1314_v45 = vunpack.c.2.s8 %v3700_v16 }
 0x1d4   : > { %v2751_v50 = vpop.eup %2750  ;;  %v1593_v36 = vmul.f32 1.442695, %v1521_v24  ;;  %v1595_v25 = vmul.f32 1.442695, %v1522_v14  ;;  %v3746_v51 = vmul.f32 %v2749_v63, %v1374_v48  ;;  %v1597_v47 = vmul.f32 1.442695, %v1523_v29 }
 0x1d5   : > { %4667 = vst [vmem:[#allocation25_spill] sm:$0xff] %v3743_v49  ;;  %v2753_v17 = vpop.eup %2752  ;;  %v3748_v38 = vmul.f32 %v2751_v50, %v1375_v18  ;;  %v1599_v56 = vmul.f32 1.442695, %v1524_v27  ;;  %v1315_v29 = vunpack.c.2.s8 %v3703_v22  ;;  %v1377_v18 = vcvt.s32.f32 %v1313_v23 }
 0x1d6   : > { %4668 = vst [vmem:[#allocation26_spill] sm:$0xff] %v3746_v51  ;;  %v1774_v53 = vadd.f32 %v3746_v51, %v3743_v49  ;;  %2754 = vpow2.f32 %v1593_v36  ;;  %v3754_v26 = vmul.f32 %v2753_v17, %v1376_v1  ;;  %v1378_v1 = vcvt.s32.f32 %v1314_v45 }
 0x1d7   : > { %4669 = vst [vmem:[#allocation27_spill] sm:$0xff] %v3748_v38  ;;  %2756 = vpow2.f32 %v1595_v25  ;;  %v1316_v25 = vunpack.c.2.s8 %v3707_v28 }
 0x1d8   : > { %v1775_v54 = vadd.f32 %v1774_v53, %v3748_v38  ;;  %4670 = vst [vmem:[#allocation28_spill] sm:$0xff] %v3754_v26  ;;  %v3757_v48 = vpop.f32.mrf.mxu0  ;;  %2758 = vpow2.f32 %v1597_v47 }
 0x1d9   : > { %2760 = vpow2.f32 %v1599_v56  ;;  %v1380_v51 = vcvt.s32.f32 %v1316_v25 }
 0x1da   : > { %v1007_v61 = vpop.permute.xlu0 %1006  ;;  %v1776_v63 = vadd.f32 %v1775_v54, %v3754_v26  ;;  %v1379_v54 = vcvt.s32.f32 %v1315_v29 }
 0x1db   : > { %v1077_v24 = vadd.f32 %v3412_v12, %v1007_v61  ;;  %v1078_v14 = vadd.f32 %v3414_v13, %v1007_v61  ;;  %v1079_v46 = vadd.f32 %v3408_v10, %v1007_v61  ;;  %v1080_v53 = vadd.f32 %v3410_v11, %v1007_v61 }
 0x1dc   : > { %v2755_v27 = vpop.eup %2754  ;;  %1777 = vadd.xlane.f32.xlu0 %v1776_v63 }
 0x1dd   : > { %v1205_v50 = vmul.f32 0.2, %v1077_v24  ;;  %v1206_v36 = vmul.f32 0.2, %v1078_v14  ;;  %vm1141_vm0 = vcmp.gt.f32.partialorder %v1077_v24, 0.0  ;;  %vm1142_vm15 = vcmp.gt.f32.partialorder %v1078_v14, 0.0  ;;  %v2757_v17 = vpop.eup %2756 }
 0x1de   : > { %vm1143_vm1 = vcmp.gt.f32.partialorder %v1079_v46, 0.0  ;;  %v1207_v47 = vmul.f32 0.2, %v1079_v46  ;;  %v2759_v26 = vpop.eup %2758  ;;  %v1208_v23 = vmul.f32 0.2, %v1080_v53  ;;  %v3770_v61 = vmul.f32 %v2755_v27, %v1377_v18 }
 0x1df   : > { %v3766_v38 = vsel %vm1141_vm0, %v1077_v24, %v1205_v50  ;;  %v3768_v56 = vsel %vm1142_vm15, %v1078_v14, %v1206_v36  ;;  %vm1144_vm2 = vcmp.gt.f32.partialorder %v1080_v53, 0.0  ;;  %v3774_v49 = vmul.f32 %v2757_v17, %v1378_v1  ;;  %v2761_v60 = vpop.eup %2760 }
 0x1e0   : > { %4671 = vst [vmem:[#allocation29_spill] sm:$0xff] %v3770_v61  ;;  %v1488_v63 = vmax.f32 %v3766_v38, %v3768_v56  ;;  %v616_v45 = vpop.f32.mrf.mxu0  ;;  %v3776_v55 = vsel %vm1143_vm1, %v1079_v46, %v1207_v47  ;;  %v3779_v29 = vmul.f32 %v2759_v26, %v1379_v54  ;;  %v3783_v18 = vsel %vm1144_vm2, %v1080_v53, %v1208_v23 }
 0x1e1   : > { %4672 = vst [vmem:[#allocation30_spill] sm:$0xff] %v3774_v49  ;;  %v1779_v14 = vadd.f32 %v3774_v49, %v3770_v61  ;;  %v3786_v36 = vmul.f32 %v2761_v60, %v1380_v51  ;;  %v1069_v1 = vadd.f32 %v3412_v12, %v3676_v40  ;;  %v1070_v53 = vadd.f32 %v3414_v13, %v3676_v40 }
 0x1e2   : > { %v1489_v24 = vmax.f32 %v1488_v63, %v3776_v55  ;;  %4673 = vst [vmem:[#allocation31_spill] sm:$0xff] %v3779_v29  ;;  %v1085_v60 = vadd.f32 %v3412_v12, %v3717_v20  ;;  %v1086_v51 = vadd.f32 %v3414_v13, %v3717_v20 }
 0x1e3   : > { %4674 = vst [vmem:[#allocation32_spill] sm:$0xff] %v3786_v36  ;;  %v1780_v27 = vadd.f32 %v1779_v14, %v3779_v29  ;;  %v1197_v47 = vmul.f32 0.2, %v1069_v1  ;;  %v1198_v54 = vmul.f32 0.2, %v1070_v53  ;;  %vm1133_vm3 = vcmp.gt.f32.partialorder %v1069_v1, 0.0  ;;  %v3803_v14 = vpop.xlane.xlu1 %1461 }
 0x1e4   : > { %v1490_v50 = vmax.f32 %v1489_v24, %v3783_v18  ;;  %v1213_v23 = vmul.f32 0.2, %v1085_v60  ;;  %v1214_v63 = vmul.f32 0.2, %v1086_v51  ;;  %v1087_v24 = vadd.f32 %v3408_v10, %v3717_v20 }
 0x1e5   : > { %v1781_v25 = vadd.f32 %v1780_v27, %v3786_v36  ;;  %vm1134_vm4 = vcmp.gt.f32.partialorder %v1070_v53, 0.0  ;;  %vm1149_vm5 = vcmp.gt.f32.partialorder %v1085_v60, 0.0  ;;  %vm1150_vm6 = vcmp.gt.f32.partialorder %v1086_v51, 0.0 }
 0x1e6   : > { %1491 = vmax.xlane.f32.xlu2 %v1490_v50  ;;  %v1072_v50 = vadd.f32 %v3410_v11, %v3676_v40  ;;  %v3807_v27 = vsel %vm1133_vm3, %v1069_v1, %v1197_v47  ;;  %v3813_v36 = vsel %vm1150_vm6, %v1086_v51, %v1214_v63  ;;  %v1088_v29 = vadd.f32 %v3410_v11, %v3717_v20 }
 0x1e7   : > { %1782 = vadd.xlane.f32.xlu0 %v1781_v25  ;;  %v3809_v25 = vsel %vm1134_vm4, %v1070_v53, %v1198_v54  ;;  %v1215_v61 = vmul.f32 0.2, %v1087_v24  ;;  %vm1151_vm8 = vcmp.gt.f32.partialorder %v1087_v24, 0.0  ;;  %v1534_v63 = vsub.f32 %v3479_v5, %v3803_v14 }
 0x1e8   : > { %v619_v46 = vpop.f32.mrf.mxu0  ;;  %vm1136_vm9 = vcmp.gt.f32.partialorder %v1072_v50, 0.0  ;;  %v1200_v20 = vmul.f32 0.2, %v1072_v50  ;;  %v1216_v51 = vmul.f32 0.2, %v1088_v29  ;;  %vm1152_vm10 = vcmp.gt.f32.partialorder %v1088_v29, 0.0 }
 0x1e9   : > { %v1318_v5 = vunpack.c.3.s8 %v3700_v16 }
 0x1ec   : > { %1021 = vperm.xlu1 %2736, %v3534_v52   ;;  %v1071_v52 = vadd.f32 %v3408_v10, %v3676_v40 }
 0x1ee   : > { %v1199_v49 = vmul.f32 0.2, %v1071_v52  ;;  %vm1135_vm7 = vcmp.gt.f32.partialorder %v1071_v52, 0.0 }
 0x1f0   : > { %v622_v26 = vpop.f32.mrf.mxu0 }
 0x1f8   : > { %v625_v17 = vpop.f32.mrf.mxu0 }
 0x1f9   : > { %2202 = vmatpush.msrb.mxu3 %v625_v17  ;;  %v3811_v17 = vsel %vm1149_vm5, %v1085_v60, %v1213_v23 }
 0x1fa   : > { %v1498_v1 = vmax.f32 %v3811_v17, %v3813_v36 }
 0x1fb   : > { %2203 = vmatpush.msrb.mxu3 %v622_v26  ;;  %v1533_v26 = vsub.f32 %v3477_v4, %v3803_v14  ;;  %v3826_v4 = vsel %vm1135_vm7, %v1071_v52, %v1199_v49  ;;  %v1317_v52 = vunpack.c.3.s8 %v3697_v59 }
 0x1fd   : > { %2204 = vmatpush.msrb.mxu3 %v619_v46  ;;  %v1478_v46 = vmax.f32 %v3807_v27, %v3809_v25  ;;  %v1617_v53 = vmul.f32 1.442695, %v1533_v26  ;;  %v3852_v26 = vld [vmem:[%s3690_s17 + $0x28] sm:$0xff] }
 0x1ff   : > { %2205 = vmatpush.msrb.mxu3 %v616_v45  ;;  %v3828_v45 = vsel %vm1151_vm8, %v1087_v24, %v1215_v61  ;;  %v3838_v49 = vmax.f32 %v1478_v46, %v3826_v4  ;;  %2762 = vpow2.f32 %v1617_v53  ;;  %v3849_v24 = vld [vmem:[%s3690_s17 + $0x20] sm:$0xff]  ;;  %v3869_v53 = vld [vmem:[%s3690_s17 + $0x30] sm:$0xff] }
 0x200   : > { %v3819_v40 = vpop.f32.mrf.mxu0  ;;  %v3841_v61 = vmax.f32 %v1498_v1, %v3828_v45  ;;  %v1619_v1 = vmul.f32 1.442695, %v1534_v63 }
 0x201   : > { %2206 = vmatpush.msrb.mxu3 %v3757_v48 }
 0x203   : > { %2207 = vmatpush.msrb.mxu3 %v3740_v31 }
 0x205   : > { %v1452_v60 = vpop.xlane.xlu0 %1451  ;;  %2208 = vmatpush.msrb.mxu3 %v3724_v44  ;;  %v3856_v44 = vsel %vm1136_vm9, %v1072_v50, %v1200_v20  ;;  %v1325_v50 = vunpack.c.1.s8 %v3849_v24 }
 0x206   : > { %v1525_v47 = vsub.f32 %v3558_v8, %v1452_v60  ;;  %v1526_v54 = vsub.f32 %v3560_v6, %v1452_v60  ;;  %v1527_v23 = vsub.f32 %v3570_v33, %v1452_v60  ;;  %v1528_v48 = vsub.f32 %v3584_v43, %v1452_v60 }
 0x207   : > { %v1535_v8 = vsub.f32 %v3488_v9, %v3803_v14  ;;  %2209 = vmatpush.msrb.mxu3 %v3710_v32  ;;  %v3859_v9 = vsel %vm1152_vm10, %v1088_v29, %v1216_v51  ;;  %v1480_v59 = vmax.f32 %v3838_v49, %v3856_v44  ;;  %v1326_v29 = vunpack.c.1.s8 %v3852_v26  ;;  %v3881_v49 = vpop.eup %2762 }
 0x208   : > { %v1601_v6 = vmul.f32 1.442695, %v1525_v47  ;;  %v1603_v33 = vmul.f32 1.442695, %v1526_v54  ;;  %v1605_v31 = vmul.f32 1.442695, %v1527_v23  ;;  %v3861_v46 = vpop.f32.mrf.mxu0  ;;  %v1500_v16 = vmax.f32 %v3841_v61, %v3859_v9  ;;  %v3875_v54 = vpop.xlane.xlu2 %1471 }
 0x209   : > { %v1607_v43 = vmul.f32 1.442695, %v1528_v48  ;;  %2210 = vmatpush.msrb.mxu3 %v3685_v15  ;;  %v1621_v32 = vmul.f32 1.442695, %v1535_v8  ;;  %v1319_v60 = vunpack.c.3.s8 %v3703_v22  ;;  %v1381_v51 = vcvt.s32.f32 %v1317_v52 }
 0x20a   : > { %2764 = vpow2.f32 %v1601_v6  ;;  %v1382_v47 = vcvt.s32.f32 %v1318_v5  ;;  %v1536_v8 = vsub.f32 %v3494_v19, %v3803_v14  ;;  %v1320_v22 = vunpack.c.3.s8 %v3707_v28 }
 0x20b   : > { %2766 = vpow2.f32 %v1603_v33  ;;  %2211 = vmatpush.msrb.mxu3 %v3671_v7  ;;  %v1327_v7 = vunpack.c.1.s8 %v3869_v53  ;;  %v1321_v19 = vunpack.c.0.s8 %v3849_v24  ;;  %v1322_v52 = vunpack.c.0.s8 %v3852_v26 }
 0x20c   : > { %2768 = vpow2.f32 %v1605_v31  ;;  %v1383_v31 = vcvt.s32.f32 %v1319_v60  ;;  %v1623_v60 = vmul.f32 1.442695, %v1536_v8  ;;  %v3915_v8 = vld [vmem:[%s3690_s17 + $0x38] sm:$0xff] }
 0x20d   : > { %2770 = vpow2.f32 %v1607_v43  ;;  %v1457_v20 = vpop.xlane.xlu0 %1456  ;;  %2212 = vmatpush.msrb.mxu3 %v3644_v34 }
 0x20e   : > { %v1529_v15 = vsub.f32 %v3578_v21, %v1457_v20  ;;  %v1530_v23 = vsub.f32 %v3580_v39, %v1457_v20  ;;  %v1531_v48 = vsub.f32 %v3593_v58, %v1457_v20  ;;  %v1532_v63 = vsub.f32 %v3606_v57, %v1457_v20 }
 0x20f   : > { %2772 = vpow2.f32 %v1619_v1  ;;  %v1541_v57 = vsub.f32 %v3513_v41, %v3875_v54  ;;  %2213 = vmatpush.msrb.mxu3 %v3616_v37  ;;  %v1389_v41 = vcvt.s32.f32 %v1325_v50  ;;  %v1390_v20 = vcvt.s32.f32 %v1326_v29 }
 0x210   : > { %v2765_v6 = vpop.eup %2764  ;;  %2774 = vpow2.f32 %v1621_v32  ;;  %v1609_v21 = vmul.f32 1.442695, %v1529_v15  ;;  %v1611_v39 = vmul.f32 1.442695, %v1530_v23  ;;  %v1613_v33 = vmul.f32 1.442695, %v1531_v48  ;;  %v3897_v5 = vpop.f32.mrf.mxu0 }
 0x211   : > { %v2767_v58 = vpop.eup %2766  ;;  %v3890_v43 = vmul.f32 %v2765_v6, %v1381_v51  ;;  %v1615_v14 = vmul.f32 1.442695, %v1532_v63  ;;  %v1384_v32 = vcvt.s32.f32 %v1320_v22  ;;  %2214 = vmatpush.msrb.mxu3 %v3590_v0  ;;  %v1542_v37 = vsub.f32 %v3515_v42, %v3875_v54 }
 0x212   : > { %v2769_v28 = vpop.eup %2768  ;;  %2776 = vpow2.f32 %v1609_v21  ;;  %v3894_v34 = vmul.f32 %v2767_v58, %v1382_v47  ;;  %v1633_v15 = vmul.f32 1.442695, %v1541_v57  ;;  %v1323_v50 = vunpack.c.0.s8 %v3869_v53 }
 0x213   : > { %v2771_v1 = vpop.eup %2770  ;;  %2778 = vpow2.f32 %v1611_v39  ;;  %v3906_v48 = vmul.f32 %v2769_v28, %v1383_v31  ;;  %v1385_v29 = vcvt.s32.f32 %v1321_v19  ;;  %2215 = vmatpush.msrb.mxu3 %v3566_v30  ;;  %v1386_v22 = vcvt.s32.f32 %v1322_v52 }
 0x214   : > { %2780 = vpow2.f32 %v1613_v33  ;;  %v1784_v51 = vadd.f32 %v3894_v34, %v3890_v43  ;;  %v3917_v6 = vmul.f32 %v2771_v1, %v1384_v32  ;;  %v1324_v21 = vunpack.c.0.s8 %v3915_v8 }
 0x215   : > { %v2773_v47 = vpop.eup %2772  ;;  %v3904_v23 = vpop.xlane.xlu0 %1466  ;;  %2782 = vpow2.f32 %v1615_v14  ;;  %v1391_v39 = vcvt.s32.f32 %v1327_v7  ;;  %2216 = vmatpush.msrb.mxu3 %v3548_v62  ;;  %v1635_v33 = vmul.f32 1.442695, %v1542_v37  ;;  %v1387_v19 = vcvt.s32.f32 %v1323_v50  ;;  %v4676_v14 = vld [vmem:[#allocation7_spill] sm:$0xff] }
 0x216   : > { %1481 = vmax.xlane.f32.xlu1 %v1480_v59  ;;  %v2775_v0 = vpop.eup %2774  ;;  %v1537_v42 = vsub.f32 %v3601_v2, %v3904_v23  ;;  %v1538_v63 = vsub.f32 %v3603_v3, %v3904_v23  ;;  %4675 = vst [vmem:[#allocation33_spill] sm:$0xff] %v3917_v6  ;;  %v1785_v59 = vadd.f32 %v1784_v51, %v3906_v48  ;;  %2784 = vpow2.f32 %v1623_v60 }
 0x217   : > { %v1539_v3 = vsub.f32 %v3613_v35, %v3904_v23  ;;  %2217 = vmatpush.msrb.mxu3 %v4676_v14  ;;  %2786 = vpow2.f32 %v1633_v15  ;;  %v1328_v62 = vunpack.c.1.s8 %v3915_v8  ;;  %v3932_v1 = vmul.f32 %v3881_v49, %v1389_v41  ;;  %v4680_v41 = vld [vmem:[#allocation10_spill] sm:$0xff] }
 0x218   : > { %v2777_v30 = vpop.eup %2776  ;;  %v1625_v58 = vmul.f32 1.442695, %v1537_v42  ;;  %v1627_v2 = vmul.f32 1.442695, %v1538_v63  ;;  %v1786_v31 = vadd.f32 %v1785_v59, %v3917_v6  ;;  %v3934_v32 = vpop.f32.mrf.mxu0  ;;  %v1388_v35 = vcvt.s32.f32 %v1324_v21 }
 0x219   : > { %v2779_v57 = vpop.eup %2778  ;;  %v3925_v28 = vmul.f32 %v2777_v30, %v1385_v29  ;;  %4677 = vst [vmem:[#allocation7_spill] sm:$0xff] %v3932_v1  ;;  %v3936_v60 = vmul.f32 %v2773_v47, %v1390_v20  ;;  %v1329_v37 = vunpack.c.2.s8 %v3849_v24  ;;  %v3941_v50 = vmul.f32 %v2775_v0, %v1391_v39  ;;  %v4683_v0 = vld [vmem:[#allocation9_spill] sm:$0xff]  ;;  %v4684_v39 = vld [vmem:[#allocation11_spill] sm:$0xff] }
 0x21a   : > { %v2781_v52 = vpop.eup %2780  ;;  %v3928_v7 = vmul.f32 %v2779_v57, %v1386_v22  ;;  %2788 = vpow2.f32 %v1625_v58  ;;  %1787 = vadd.xlane.f32.xlu0 %v1786_v31  ;;  %v1330_v49 = vunpack.c.2.s8 %v3852_v26  ;;  %v1540_v29 = vsub.f32 %v4680_v41, %v3904_v23  ;;  %v4682_v22 = vld [vmem:[#allocation8_spill] sm:$0xff]  ;;  %v4685_v58 = vld [vmem:[#allocation14_spill] sm:$0xff] }
 0x21b   : > { %4678 = vst [vmem:[#allocation34_spill] sm:$0xff] %v3936_v60  ;;  %v2783_v51 = vpop.eup %2782  ;;  %2790 = vpow2.f32 %v1627_v2  ;;  %v1629_v42 = vmul.f32 1.442695, %v1539_v3  ;;  %v3949_v47 = vmul.f32 %v2781_v52, %v1387_v19  ;;  %v3956_v2 = vld [vmem:[%s3690_s17 + $0x40] sm:$0xff]  ;;  %v1794_v61 = vadd.f32 %v3936_v60, %v3932_v1 }
 0x21c   : > { %v1789_v15 = vadd.f32 %v3928_v7, %v3925_v28  ;;  %4679 = vst [vmem:[#allocation35_spill] sm:$0xff] %v3941_v50  ;;  %2792 = vpow2.f32 %v1635_v33  ;;  %v2785_v63 = vpop.eup %2784  ;;  %v3958_v23 = vmul.f32 %v2783_v51, %v1388_v35  ;;  %v1393_v3 = vcvt.s32.f32 %v1329_v37  ;;  %v3970_v51 = vld [vmem:[%s3690_s17 + $0x50] sm:$0xff] }
 0x21d   : > { %v1477_v20 = vpop.xlane.xlu0 %1476  ;;  %4681 = vst [vmem:[#allocation10_spill] sm:$0xff] %v3949_v47  ;;  %v3966_v31 = vpop.eup %2786  ;;  %v1394_v41 = vcvt.s32.f32 %v1330_v49  ;;  %2794 = vpow2.f32 %v1629_v42  ;;  %v1392_v49 = vcvt.s32.f32 %v1328_v62  ;;  %v1333_v42 = vunpack.c.3.s8 %v3849_v24 }
 0x21e   : > { %1501 = vmax.xlane.f32.xlu1 %v1500_v16  ;;  %v1545_v59 = vsub.f32 %v4682_v22, %v1477_v20  ;;  %v1546_v21 = vsub.f32 %v4683_v0, %v1477_v20  ;;  %v1547_v30 = vsub.f32 %v4684_v39, %v1477_v20  ;;  %v1548_v33 = vsub.f32 %v4685_v58, %v1477_v20  ;;  %v3964_v16 = vld [vmem:[%s3690_s17 + $0x48] sm:$0xff]  ;;  %v4687_v39 = vld [vmem:[#allocation5_spill] sm:$0xff] }
 0x21f   : > { %4686 = vst [vmem:[#allocation8_spill] sm:$0xff] %v3958_v23  ;;  %v1790_v57 = vadd.f32 %v1789_v15, %v3949_v47  ;;  %v1631_v22 = vmul.f32 1.442695, %v1540_v29  ;;  %v1337_v15 = vunpack.c.0.s8 %v3956_v2  ;;  %v1543_v37 = vsub.f32 %v4687_v39, %v3875_v54 }
 0x220   : > { %v1641_v19 = vmul.f32 1.442695, %v1545_v59  ;;  %v1643_v14 = vmul.f32 1.442695, %v1546_v21  ;;  %v1645_v52 = vmul.f32 1.442695, %v1547_v30  ;;  %v2789_v20 = vpop.eup %2788  ;;  %v1338_v59 = vunpack.c.0.s8 %v3964_v16  ;;  %v3978_v30 = vpop.f32.mrf.mxu0 }
 0x221   : > { %v1791_v35 = vadd.f32 %v1790_v57, %v3958_v23  ;;  %v2791_v0 = vpop.eup %2790  ;;  %v1647_v58 = vmul.f32 1.442695, %v1548_v33  ;;  %v1331_v29 = vunpack.c.2.s8 %v3869_v53  ;;  %v1795_v57 = vadd.f32 %v1794_v61, %v3941_v50  ;;  %v3982_v23 = vld [vmem:[%s3690_s17 + $0x58] sm:$0xff] }
 0x222   : > { %2796 = vpow2.f32 %v1641_v19  ;;  %v2793_v21 = vpop.eup %2792  ;;  %v1339_v19 = vunpack.c.0.s8 %v3970_v51  ;;  %v1334_v33 = vunpack.c.3.s8 %v3852_v26  ;;  %v1401_v39 = vcvt.s32.f32 %v1337_v15 }
 0x223   : > { %2798 = vpow2.f32 %v1643_v14  ;;  %1792 = vadd.xlane.f32.xlu0 %v1791_v35  ;;  %v3986_v14 = vmul.f32 %v2789_v20, %v1393_v3  ;;  %v3988_v62 = vmul.f32 %v2791_v0, %v1394_v41  ;;  %v4688_v35 = vld [vmem:[#allocation6_spill] sm:$0xff]  ;;  %v1637_v6 = vmul.f32 1.442695, %v1543_v37  ;;  %v2795_v60 = vpop.eup %2794 }
 0x224   : > { %2800 = vpow2.f32 %v1645_v52  ;;  %v1544_v24 = vsub.f32 %v4688_v35, %v3875_v54  ;;  %v1402_v52 = vcvt.s32.f32 %v1338_v59  ;;  %v3992_v61 = vmul.f32 %v2785_v63, %v1392_v49 }
 0x225   : > { %2802 = vpow2.f32 %v1631_v22  ;;  %v1340_v50 = vunpack.c.0.s8 %v3982_v23  ;;  %v1332_v1 = vunpack.c.2.s8 %v3915_v8  ;;  %v1395_v26 = vcvt.s32.f32 %v1331_v29 }
 0x226   : > { %2804 = vpow2.f32 %v1647_v58  ;;  %4689 = vst [vmem:[#allocation9_spill] sm:$0xff] %v3992_v61  ;;  %v1397_v15 = vcvt.s32.f32 %v1333_v42  ;;  %v1398_v3 = vcvt.s32.f32 %v1334_v33  ;;  %v1796_v41 = vadd.f32 %v1795_v57, %v3992_v61 }
 0x227   : > { %v1403_v0 = vcvt.s32.f32 %v1339_v19  ;;  %v1799_v54 = vadd.f32 %v3988_v62, %v3986_v14  ;;  %2806 = vpow2.f32 %v1637_v6  ;;  %v1639_v63 = vmul.f32 1.442695, %v1544_v24 }
 0x228   : > { %v2797_v22 = vpop.eup %2796  ;;  %v1404_v49 = vcvt.s32.f32 %v1340_v50  ;;  %v1396_v29 = vcvt.s32.f32 %v1332_v1  ;;  %v4003_v42 = vmul.f32 %v2795_v60, %v1395_v26  ;;  %v1335_v33 = vunpack.c.3.s8 %v3869_v53 }
 0x229   : > { %v2799_v20 = vpop.eup %2798  ;;  %v3997_v47 = vmul.f32 %v2797_v22, %v1401_v39  ;;  %v4012_v6 = vmul.f32 %v3966_v31, %v1397_v15  ;;  %v4014_v24 = vmul.f32 %v2793_v21, %v1398_v3  ;;  %2808 = vpow2.f32 %v1639_v63  ;;  %v4034_v63 = vpop.xlane.xlu0 %1486 }
 0x22a   : > { %v2801_v37 = vpop.eup %2800  ;;  %v4001_v58 = vmul.f32 %v2799_v20, %v1402_v52  ;;  %v1800_v35 = vadd.f32 %v1799_v54, %v4003_v42  ;;  %v643_v52 = vpop.f32.mrf.mxu0  ;;  %v1336_v1 = vunpack.c.3.s8 %v3915_v8  ;;  %v1399_v26 = vcvt.s32.f32 %v1335_v33 }
 0x22b   : > { %4690 = vst [vmem:[#allocation11_spill] sm:$0xff] %v3997_v47  ;;  %v2803_v59 = vpop.eup %2802  ;;  %1797 = vadd.xlane.f32.xlu0 %v1796_v41  ;;  %v4008_v39 = vmul.f32 %v2801_v37, %v1403_v0  ;;  %v1804_v31 = vadd.f32 %v4014_v24, %v4012_v6 }
 0x22c   : > { %4691 = vst [vmem:[#allocation14_spill] sm:$0xff] %v4001_v58  ;;  %v2805_v57 = vpop.eup %2804  ;;  %v1809_v19 = vadd.f32 %v4001_v58, %v3997_v47  ;;  %v4020_v50 = vmul.f32 %v2803_v59, %v1396_v29  ;;  %v1400_v21 = vcvt.s32.f32 %v1336_v1 }
 0x22d   : > { %4692 = vst [vmem:[#allocation5_spill] sm:$0xff] %v4008_v39  ;;  %v4017_v60 = vmul.f32 %v2805_v57, %v1404_v49  ;;  %v2807_v22 = vpop.eup %2806  ;;  %v1027_v49 = vpop.permute.xlu2 %1026 }
 0x22e   : > { %v1810_v53 = vadd.f32 %v1809_v19, %v4008_v39  ;;  %4694 = vst [vmem:[#allocation36_spill] sm:$0xff] %v4020_v50  ;;  %v1801_v41 = vadd.f32 %v1800_v35, %v4020_v50  ;;  %v4026_v15 = vmul.f32 %v2807_v22, %v1399_v26  ;;  %v1093_v57 = vadd.f32 %v3412_v12, %v1027_v49  ;;  %v4697_v22 = vld [vmem:[#allocation13_spill] sm:$0xff] }
 0x22f   : > { %4693 = vst [vmem:[#allocation6_spill] sm:$0xff] %v4017_v60  ;;  %v2809_v8 = vpop.eup %2808 }
 0x230   : > { %v1811_v20 = vadd.f32 %v1810_v53, %v4017_v60  ;;  %v1805_v3 = vadd.f32 %v1804_v31, %v4026_v15  ;;  %v4029_v54 = vmul.f32 %v2809_v8, %v1400_v21  ;;  %v1221_v35 = vmul.f32 0.2, %v1093_v57  ;;  %v4700_v60 = vld [vmem:[#allocation21_spill] sm:$0xff] }
 0x231   : > { %v4039_v29 = vpop.xlane.xlu0 %1496  ;;  %vm1157_vm12 = vcmp.gt.f32.partialorder %v1093_v57, 0.0  ;;  %v4051_v31 = vadd.f32 %v3408_v10, %v1027_v49  ;;  %v4054_v21 = vadd.f32 %v3410_v11, %v1027_v49 }
 0x232   : > { %1812 = vadd.xlane.f32.xlu2 %v1811_v20  ;;  %v646_v0 = vpop.f32.mrf.mxu0  ;;  %4695 = vst [vmem:[#allocation37_spill] sm:$0xff] %v4029_v54  ;;  %v1806_v37 = vadd.f32 %v1805_v3, %v4029_v54  ;;  %v1554_v20 = vsub.f32 %v4697_v22, %v4034_v63  ;;  %v4701_v54 = vld [vmem:[#allocation22_spill] sm:$0xff] }
 0x233   : > { %1802 = vadd.xlane.f32.xlu0 %v1801_v41  ;;  %2276 = vmatpush.msra.mxu1 %v646_v0  ;;  %v4056_v0 = vsel %vm1157_vm12, %v1093_v57, %v1221_v35  ;;  %v4072_v35 = vmul.f32 0.2, %v4051_v31  ;;  %vm1159_vm5 = vcmp.gt.f32.partialorder %v4051_v31, 0.0  ;;  %vm1160_vm10 = vcmp.gt.f32.partialorder %v4054_v21, 0.0 }
 0x234   : > { %v1659_v22 = vmul.f32 1.442695, %v1554_v20  ;;  %v4703_v20 = vld [vmem:[#allocation18_spill] sm:$0xff] }
 0x235   : > { %2277 = vmatpush.msra.mxu1 %v643_v52 }
 0x237   : > { %2278 = vmatpush.msra.mxu1 %v3978_v30  ;;  %v1094_v30 = vadd.f32 %v3414_v13, %v1027_v49 }
 0x239   : > { %2279 = vmatpush.msra.mxu1 %v3934_v32  ;;  %v1222_v1 = vmul.f32 0.2, %v1094_v30  ;;  %vm1158_vm13 = vcmp.gt.f32.partialorder %v1094_v30, 0.0 }
 0x23b   : > { %1807 = vadd.xlane.f32.xlu0 %v1806_v37  ;;  %2280 = vmatpush.msra.mxu1 %v3897_v5  ;;  %v4058_v37 = vsel %vm1158_vm13, %v1094_v30, %v1222_v1  ;;  %v4075_v1 = vmul.f32 0.2, %v4054_v21 }
 0x23d   : > { %2281 = vmatpush.msra.mxu1 %v3861_v46 }
 0x23f   : > { %2282 = vmatpush.msra.mxu1 %v3819_v40  ;;  %v4696_v40 = vld [vmem:[#allocation12_spill] sm:$0xff] }
 0x240   : > { %v1553_v26 = vsub.f32 %v4696_v40, %v4034_v63 }
 0x242   : > { %v1657_v40 = vmul.f32 1.442695, %v1553_v26  ;;  %v1349_v26 = vunpack.c.3.s8 %v3956_v2 }
 0x246   : > { %v1773_v59 = vpop.xlane.xlu1 %1772 }
 0x247   : > { %2810 = vrcp.f32 %v1773_v59  ;;  %v1860_v52 = vand.u32 2147483648, %v1773_v59  ;;  %v1858_v46 = vand.u32 2147483647, %v1773_v59  ;;  %vm1854_vm14 = vweird.f32 %v1773_v59 }
 0x249   : > { %v1861_v8 = vor.u32 1.1754944e-38, %v1860_v52  ;;  %vm1859_vm15 = vcmp.eq.f32.partialorder %v1858_v46, 8.507059e+37  ;;  %v4702_v52 = vld [vmem:[#allocation23_spill] sm:$0xff] }
 0x24d   : > { %v2811_v33 = vpop.eup %2810 }
 0x24e   : > { %v1850_v19 = vmul.f32 %v2811_v33, %v1773_v59  ;;  %vm1855_vm11 = vweird.f32 %v2811_v33  ;;  %v1345_v59 = vunpack.c.2.s8 %v3956_v2 }
 0x24f   : > { %v4043_v53 = vpop.xlane.xlu0 %1777  ;;  %vm1856_vm0 = vmor %vm1854_vm14, %vm1855_vm11 }
 0x250   : > { %v1851_v32 = vsub.f32 1.0, %v1850_v19  ;;  %2812 = vrcp.f32 %v4043_v53  ;;  %v4698_v19 = vld [vmem:[#allocation15_spill] sm:$0xff]  ;;  %vm1868_vm2 = vweird.f32 %v4043_v53 }
 0x251   : > { %2814 = vpow2.f32 %v1657_v40 }
 0x252   : > { %v1852_v5 = vmul.f32 %v2811_v33, %v1851_v32  ;;  %v1555_v32 = vsub.f32 %v4698_v19, %v4034_v63  ;;  %2816 = vpow2.f32 %v1659_v22 }
 0x254   : > { %v1853_v41 = vadd.f32 %v2811_v33, %v1852_v5 }
 0x256   : > { %v1857_v3 = vsel %vm1856_vm0, %v2811_v33, %v1853_v41  ;;  %v2813_v30 = vpop.eup %2812  ;;  %v1413_v41 = vcvt.s32.f32 %v1349_v26 }
 0x257   : > { %v4062_v5 = vsel %vm1859_vm15, %v1861_v8, %v1857_v3  ;;  %v1864_v46 = vmul.f32 %v2813_v30, %v4043_v53  ;;  %v4084_v8 = vmul.f32 1.442695, %v1555_v32  ;;  %v4086_v3 = vcvt.s32.f32 %v1345_v59 }
 0x258   : > { %4699 = vst [vmem:[#allocation12_spill] sm:$0xff] %v4062_v5  ;;  %v2073_v49 = vmul.f32 %v4062_v5, %v4700_v60  ;;  %v2074_v33 = vmul.f32 %v4062_v5, %v4701_v54  ;;  %v2075_v57 = vmul.f32 %v4062_v5, %v4702_v52  ;;  %v1351_v52 = vunpack.c.3.s8 %v3970_v51 }
 0x259   : > { %v1865_v19 = vsub.f32 1.0, %v1864_v46  ;;  %v1352_v46 = vunpack.c.3.s8 %v3982_v23  ;;  %vm1869_vm1 = vweird.f32 %v2813_v30 }
 0x25a   : > { %2153 = vmatmul.f32.vlgmr.msra.gmra.mxu2 %v2073_v49  ;;  %2218 = vmatmul.f32.vlgmr.msrb.gmra.mxu3 %v2074_v33  ;;  %v1492_v49 = vpop.xlane.xlu2 %1491  ;;  %v1350_v33 = vunpack.c.3.s8 %v3964_v16  ;;  %v4095_v59 = vpop.xlane.xlu0 %1782  ;;  %vm1870_vm3 = vmor %vm1868_vm2, %vm1869_vm1 }
 0x25b   : > { %2283 = vmatmul.f32.vlgmr.msra.gmra.mxu1 %v2075_v57  ;;  %v1557_v60 = vsub.f32 %v3766_v38, %v1492_v49  ;;  %v1558_v54 = vsub.f32 %v3768_v56, %v1492_v49  ;;  %v1559_v50 = vsub.f32 %v3776_v55, %v1492_v49  ;;  %v1560_v40 = vsub.f32 %v3783_v18, %v1492_v49  ;;  %v4101_v18 = vpop.eup %2814 }
 0x25c   : > { %v1866_v32 = vmul.f32 %v2813_v30, %v1865_v19  ;;  %v1874_v57 = vand.u32 2147483648, %v4043_v53  ;;  %2818 = vrcp.f32 %v4095_v59  ;;  %v1872_v56 = vand.u32 2147483647, %v4043_v53 }
 0x25d   : > { %v1665_v61 = vmul.f32 1.442695, %v1557_v60  ;;  %v1667_v5 = vmul.f32 1.442695, %v1558_v54  ;;  %v1669_v39 = vmul.f32 1.442695, %v1559_v50  ;;  %v4106_v60 = vpop.eup %2816  ;;  %vm1882_vm12 = vweird.f32 %v4095_v59 }
 0x25e   : > { %v1022_v22 = vpop.permute.xlu1 %1021  ;;  %v1671_v38 = vmul.f32 1.442695, %v1560_v40  ;;  %v1875_v50 = vor.u32 1.1754944e-38, %v1874_v57  ;;  %v1867_v49 = vadd.f32 %v2813_v30, %v1866_v32  ;;  %vm1873_vm6 = vcmp.eq.f32.partialorder %v1872_v56, 8.507059e+37 }
 0x25f   : > { %v1089_v55 = vadd.f32 %v3412_v12, %v1022_v22  ;;  %2820 = vpow2.f32 %v1665_v61  ;;  %v1090_v19 = vadd.f32 %v3414_v13, %v1022_v22  ;;  %v1091_v26 = vadd.f32 %v3408_v10, %v1022_v22 }
 0x260   : > { %2822 = vpow2.f32 %v1667_v5  ;;  %v1092_v12 = vadd.f32 %v3410_v11, %v1022_v22  ;;  %v1871_v61 = vsel %vm1870_vm3, %v2813_v30, %v1867_v49  ;;  %v1414_v5 = vcvt.s32.f32 %v1350_v33  ;;  %v4706_v22 = vld [vmem:[#allocation26_spill] sm:$0xff]  ;;  %v4707_v30 = vld [vmem:[#allocation27_spill] sm:$0xff] }
 0x261   : > { %v1217_v54 = vmul.f32 0.2, %v1089_v55  ;;  %2824 = vpow2.f32 %v1669_v39  ;;  %v1218_v40 = vmul.f32 0.2, %v1090_v19  ;;  %vm1153_vm4 = vcmp.gt.f32.partialorder %v1089_v55, 0.0  ;;  %v4705_v39 = vld [vmem:[#allocation25_spill] sm:$0xff] }
 0x262   : > { %2826 = vpow2.f32 %v1671_v38  ;;  %vm1154_vm7 = vcmp.gt.f32.partialorder %v1090_v19, 0.0  ;;  %v2819_v13 = vpop.eup %2818  ;;  %v4110_v10 = vsel %vm1873_vm6, %v1875_v50, %v1871_v61  ;;  %v1219_v53 = vmul.f32 0.2, %v1091_v26 }
 0x263   : > { %4704 = vst [vmem:[#allocation13_spill] sm:$0xff] %v4110_v10  ;;  %v4112_v57 = vsel %vm1153_vm4, %v1089_v55, %v1217_v54  ;;  %v1878_v32 = vmul.f32 %v2819_v13, %v4095_v59  ;;  %v2077_v11 = vmul.f32 %v4110_v10, %v4705_v39  ;;  %v2078_v58 = vmul.f32 %v4110_v10, %v4706_v22 }
 0x264   : > { %vm1155_vm8 = vcmp.gt.f32.partialorder %v1091_v26, 0.0  ;;  %v2079_v56 = vmul.f32 %v4110_v10, %v4707_v30  ;;  %v1220_v49 = vmul.f32 0.2, %v1092_v12  ;;  %v4121_v50 = vsel %vm1154_vm7, %v1090_v19, %v1218_v40 }
 0x265   : > { %v2821_v38 = vpop.eup %2820  ;;  %v1415_v61 = vcvt.s32.f32 %v1351_v52  ;;  %v1879_v54 = vsub.f32 1.0, %v1878_v32  ;;  %2156 = vmatmul.f32.gmra.mxu2 %v2077_v11  ;;  %2221 = vmatmul.f32.gmra.mxu3 %v2078_v58  ;;  %vm1156_vm9 = vcmp.gt.f32.partialorder %v1092_v12, 0.0  ;;  %v1503_v33 = vmax.f32 %v4112_v57, %v4121_v50 }
 0x266   : > { %v2823_v55 = vpop.eup %2822  ;;  %v4125_v39 = vmul.f32 %v2821_v38, %v1413_v41  ;;  %v1888_v47 = vand.u32 2147483648, %v4095_v59  ;;  %2286 = vmatmul.f32.gmra.mxu1 %v2079_v56  ;;  %v4130_v19 = vsel %vm1155_vm8, %v1091_v26, %v1219_v53  ;;  %v1416_v52 = vcvt.s32.f32 %v1352_v46 }
 0x267   : > { %v2825_v22 = vpop.eup %2824  ;;  %v4132_v40 = vmul.f32 %v2823_v55, %v1414_v5  ;;  %v1880_v58 = vmul.f32 %v2819_v13, %v1879_v54  ;;  %vm1883_vm11 = vweird.f32 %v2819_v13  ;;  %v1504_v11 = vmax.f32 %v1503_v33, %v4130_v19 }
 0x268   : > { %v2827_v32 = vpop.eup %2826  ;;  %v1886_v41 = vand.u32 2147483647, %v4095_v59  ;;  %v4136_v38 = vsel %vm1156_vm9, %v1092_v12, %v1220_v49  ;;  %v4138_v30 = vmul.f32 %v2825_v22, %v1415_v61  ;;  %v4708_v26 = vunpack.c.2.s8 %v3964_v16  ;;  %vm1884_vm13 = vmor %vm1882_vm12, %vm1883_vm11 }
 0x269   : > { %v1824_v56 = vadd.f32 %v4132_v40, %v4125_v39  ;;  %v4709_v46 = vsub.f32 %v4703_v20, %v4034_v63  ;;  %v1505_v55 = vmax.f32 %v1504_v11, %v4136_v38  ;;  %v1881_v54 = vadd.f32 %v2819_v13, %v1880_v58  ;;  %v4715_v58 = vld [vmem:[#allocation31_spill] sm:$0xff] }
 0x26a   : > { %v1410_v53 = vcvt.s32.f32 %v4708_v26  ;;  %2828 = vpow2.f32 %v4084_v8  ;;  %v1889_v12 = vor.u32 1.1754944e-38, %v1888_v47  ;;  %v4150_v49 = vmul.f32 %v2827_v32, %v1416_v52  ;;  %v4713_v52 = vld [vmem:[#allocation29_spill] sm:$0xff] }
 0x26b   : > { %v1663_v5 = vmul.f32 1.442695, %v4709_v46  ;;  %v1825_v61 = vadd.f32 %v1824_v56, %v4138_v30  ;;  %1506 = vmax.xlane.f32.xlu1 %v1505_v55  ;;  %v1885_v33 = vsel %vm1884_vm13, %v2819_v13, %v1881_v54  ;;  %vm1887_vm14 = vcmp.eq.f32.partialorder %v1886_v41, 8.507059e+37 }
 0x26c   : > { %4710 = vst [vmem:[#allocation15_spill] sm:$0xff] %v4150_v49  ;;  %v4157_v63 = vsel %vm1159_vm5, %v4051_v31, %v4072_v35  ;;  %v1347_v20 = vunpack.c.2.s8 %v3970_v51  ;;  %v4161_v8 = vsel %vm1887_vm14, %v1889_v12, %v1885_v33  ;;  %v4712_v47 = vmax.f32 %v4056_v0, %v4058_v37  ;;  %v4714_v31 = vld [vmem:[#allocation30_spill] sm:$0xff]  ;;  %v4718_v33 = vld [vmem:[#allocation17_spill] sm:$0xff] }
 0x26d   : > { %v1826_v59 = vadd.f32 %v1825_v61, %v4150_v49  ;;  %4711 = vst [vmem:[#allocation21_spill] sm:$0xff] %v4161_v8  ;;  %v4169_v13 = vmul.f32 %v4101_v18, %v4086_v3  ;;  %v2081_v32 = vmul.f32 %v4161_v8, %v4713_v52  ;;  %v2082_v35 = vmul.f32 %v4161_v8, %v4714_v31 }
 0x26e   : > { %v1509_v22 = vmax.f32 %v4712_v47, %v4157_v63  ;;  %v2083_v11 = vmul.f32 %v4161_v8, %v4715_v58  ;;  %v4178_v41 = vmul.f32 %v4106_v60, %v1410_v53  ;;  %2830 = vpow2.f32 %v1663_v5  ;;  %v4201_v47 = vld [vmem:[%s3690_s17 + $0x60] sm:$0xff] }
 0x26f   : > { %1827 = vadd.xlane.f32.xlu2 %v1826_v59  ;;  %2159 = vmatmul.f32.gmra.mxu2 %v2081_v32  ;;  %v1348_v56 = vunpack.c.2.s8 %v3982_v23  ;;  %v1411_v3 = vcvt.s32.f32 %v1347_v20  ;;  %v4185_v26 = vsel %vm1160_vm10, %v4054_v21, %v4075_v1  ;;  %v4717_v21 = vld [vmem:[#allocation16_spill] sm:$0xff]  ;;  %v1562_v20 = vsub.f32 %v4718_v33, %v4039_v29 }
 0x270   : > { %2224 = vmatmul.f32.gmra.mxu3 %v2082_v35  ;;  %v2829_v18 = vpop.eup %2828  ;;  %2289 = vmatmul.f32.gmra.mxu1 %v2083_v11  ;;  %v1510_v46 = vmax.f32 %v1509_v22, %v4185_v26  ;;  %v1819_v60 = vadd.f32 %v4178_v41, %v4169_v13  ;;  %v1561_v1 = vsub.f32 %v4717_v21, %v4039_v29  ;;  %v4208_v11 = vld [vmem:[%s3690_s17 + $0x68] sm:$0xff] }
 0x271   : > { %v1412_v53 = vcvt.s32.f32 %v1348_v56  ;;  %v4190_v5 = vmul.f32 %v2829_v18, %v1411_v3  ;;  %v1675_v22 = vmul.f32 1.442695, %v1562_v20  ;;  %v1353_v56 = vunpack.c.0.s8 %v4201_v47 }
 0x272   : > { %v1673_v59 = vmul.f32 1.442695, %v1561_v1 }
 0x273   : > { %1511 = vmax.xlane.f32.xlu1 %v1510_v46  ;;  %v1820_v54 = vadd.f32 %v1819_v60, %v4190_v5  ;;  %v4719_v60 = vld [vmem:[#allocation19_spill] sm:$0xff]  ;;  %v1417_v21 = vcvt.s32.f32 %v1353_v56  ;;  %v4231_v56 = vld [vmem:[%s3690_s17 + $0x78] sm:$0xff] }
 0x274   : > { %v2831_v55 = vpop.eup %2830  ;;  %2832 = vpow2.f32 %v1673_v59 }
 0x275   : > { %v4193_v12 = vmul.f32 %v2831_v55, %v1412_v53  ;;  %v1563_v53 = vsub.f32 %v4719_v60, %v4039_v29  ;;  %2834 = vpow2.f32 %v1675_v22 }
 0x277   : > { %4716 = vst [vmem:[#allocation22_spill] sm:$0xff] %v4193_v12  ;;  %v1821_v61 = vadd.f32 %v1820_v54, %v4193_v12  ;;  %v4720_v54 = vld [vmem:[#allocation20_spill] sm:$0xff]  ;;  %v1677_v1 = vmul.f32 1.442695, %v1563_v53 }
 0x27a   : > { %v2833_v59 = vpop.eup %2832 }
 0x27b   : > { %1822 = vadd.xlane.f32.xlu1 %v1821_v61  ;;  %v1564_v61 = vsub.f32 %v4720_v54, %v4039_v29 }
 0x289   : > { %v1482_v52 = vpop.xlane.xlu1 %1481 }
 0x28a   : > { %v1549_v32 = vsub.f32 %v3807_v27, %v1482_v52  ;;  %v1550_v31 = vsub.f32 %v3809_v25, %v1482_v52  ;;  %v1551_v35 = vsub.f32 %v3826_v4, %v1482_v52  ;;  %v1552_v58 = vsub.f32 %v3856_v44, %v1482_v52 }
 0x28b   : > { %v1341_v27 = vunpack.c.1.s8 %v3956_v2  ;;  %v1342_v25 = vunpack.c.1.s8 %v3964_v16  ;;  %v1354_v44 = vunpack.c.0.s8 %v4208_v11  ;;  %v1343_v2 = vunpack.c.1.s8 %v3970_v51 }
 0x28c   : > { %v1649_v3 = vmul.f32 1.442695, %v1549_v32  ;;  %v1651_v18 = vmul.f32 1.442695, %v1550_v31  ;;  %v1653_v46 = vmul.f32 1.442695, %v1551_v35  ;;  %v2835_v32 = vpop.eup %2834  ;;  %v1344_v35 = vunpack.c.1.s8 %v3982_v23 }
 0x28d   : > { %v1655_v55 = vmul.f32 1.442695, %v1552_v58  ;;  %v4215_v4 = vpop.xlane.xlu0 %1787  ;;  %v1405_v20 = vcvt.s32.f32 %v1341_v27  ;;  %v1406_v52 = vcvt.s32.f32 %v1342_v25  ;;  %v4228_v58 = vld [vmem:[%s3690_s17 + $0x70] sm:$0xff]  ;;  %v1418_v51 = vcvt.s32.f32 %v1354_v44 }
 0x28e   : > { %2836 = vpow2.f32 %v1649_v3  ;;  %v1355_v27 = vunpack.c.0.s8 %v4228_v58  ;;  %v1358_v25 = vunpack.c.1.s8 %v4208_v11  ;;  %vm1896_vm15 = vweird.f32 %v4215_v4 }
 0x28f   : > { %2838 = vpow2.f32 %v1651_v18  ;;  %v1679_v18 = vmul.f32 1.442695, %v1564_v61 }
 0x290   : > { %2840 = vpow2.f32 %v1653_v46 }
 0x291   : > { %2842 = vpow2.f32 %v1655_v55  ;;  %v1502_v33 = vpop.xlane.xlu1 %1501  ;;  %v1407_v55 = vcvt.s32.f32 %v1343_v2  ;;  %v4243_v2 = vmul.f32 %v2833_v59, %v1417_v21 }
 0x292   : > { %2844 = vrcp.f32 %v4215_v4  ;;  %v1565_v16 = vsub.f32 %v3811_v17, %v1502_v33  ;;  %v1566_v22 = vsub.f32 %v3813_v36, %v1502_v33  ;;  %v1567_v29 = vsub.f32 %v3828_v45, %v1502_v33 }
 0x293   : > { %v1568_v31 = vsub.f32 %v3859_v9, %v1502_v33  ;;  %v1357_v17 = vunpack.c.1.s8 %v4201_v47  ;;  %2846 = vpow2.f32 %v1677_v1  ;;  %v1408_v33 = vcvt.s32.f32 %v1344_v35 }
 0x294   : > { %v2837_v3 = vpop.eup %2836  ;;  %v1681_v46 = vmul.f32 1.442695, %v1565_v16  ;;  %v1683_v60 = vmul.f32 1.442695, %v1566_v22  ;;  %v1685_v53 = vmul.f32 1.442695, %v1567_v29  ;;  %v1356_v1 = vunpack.c.0.s8 %v4231_v56 }
 0x295   : > { %v2839_v36 = vpop.eup %2838  ;;  %v4234_v45 = vmul.f32 %v2837_v3, %v1405_v20  ;;  %v1687_v54 = vmul.f32 1.442695, %v1568_v31  ;;  %v4245_v20 = vmul.f32 %v2835_v32, %v1418_v51  ;;  %v1421_v22 = vcvt.s32.f32 %v1357_v17 }
 0x296   : > { %v2841_v9 = vpop.eup %2840  ;;  %2848 = vpow2.f32 %v1681_v46  ;;  %v4236_v23 = vmul.f32 %v2839_v36, %v1406_v52  ;;  %v4240_v61 = vpop.xlane.xlu0 %1792  ;;  %v1419_v35 = vcvt.s32.f32 %v1355_v27  ;;  %v1359_v3 = vunpack.c.1.s8 %v4228_v58 }
 0x297   : > { %v2843_v44 = vpop.eup %2842  ;;  %2850 = vpow2.f32 %v1683_v60  ;;  %v4248_v29 = vmul.f32 %v2841_v9, %v1407_v55  ;;  %v1422_v46 = vcvt.s32.f32 %v1358_v25  ;;  %v1902_v60 = vand.u32 2147483648, %v4215_v4 }
 0x298   : > { %v2845_v16 = vpop.eup %2844  ;;  %2852 = vpow2.f32 %v1679_v18  ;;  %v1814_v31 = vadd.f32 %v4236_v23, %v4234_v45  ;;  %v4254_v59 = vmul.f32 %v2843_v44, %v1408_v33  ;;  %v1900_v17 = vand.u32 2147483647, %v4215_v4 }
 0x299   : > { %v1892_v52 = vmul.f32 %v2845_v16, %v4215_v4  ;;  %2854 = vpow2.f32 %v1685_v53  ;;  %v2847_v18 = vpop.eup %2846  ;;  %v1829_v36 = vadd.f32 %v4245_v20, %v4243_v2  ;;  %v1360_v53 = vunpack.c.1.s8 %v4231_v56 }
 0x29a   : > { %2856 = vrcp.f32 %v4240_v61  ;;  %v1815_v32 = vadd.f32 %v1814_v31, %v4248_v29  ;;  %vm1897_vm0 = vweird.f32 %v2845_v16  ;;  %v4265_v33 = vmul.f32 %v2847_v18, %v1419_v35 }
 0x29b   : > { %v1893_v21 = vsub.f32 1.0, %v1892_v52  ;;  %2858 = vpow2.f32 %v1687_v54  ;;  %v1420_v54 = vcvt.s32.f32 %v1356_v1  ;;  %v1423_v52 = vcvt.s32.f32 %v1359_v3  ;;  %vm1898_vm1 = vmor %vm1896_vm15, %vm1897_vm0 }
 0x29c   : > { %v2849_v51 = vpop.eup %2848  ;;  %v1816_v27 = vadd.f32 %v1815_v32, %v4254_v59  ;;  %v1903_v10 = vor.u32 1.1754944e-38, %v1902_v60  ;;  %v1424_v1 = vcvt.s32.f32 %v1360_v53  ;;  %vm1901_vm2 = vcmp.eq.f32.partialorder %v1900_v17, 8.507059e+37 }
 0x29d   : > { %v2851_v55 = vpop.eup %2850  ;;  %v1894_v9 = vmul.f32 %v2845_v16, %v1893_v21  ;;  %v4263_v25 = vmul.f32 %v2849_v51, %v1421_v22  ;;  %v1830_v22 = vadd.f32 %v1829_v36, %v4265_v33  ;;  %vm1910_vm4 = vweird.f32 %v4240_v61 }
 0x29e   : > { %v2853_v44 = vpop.eup %2852  ;;  %v4267_v31 = vmul.f32 %v2851_v55, %v1422_v46  ;;  %v4270_v12 = vpop.xlane.xlu0 %1797  ;;  %1817 = vadd.xlane.f32.xlu0 %v1816_v27 }
 0x29f   : > { %v2855_v49 = vpop.eup %2854  ;;  %v1895_v8 = vadd.f32 %v2845_v16, %v1894_v9  ;;  %2860 = vrcp.f32 %v4270_v12  ;;  %v4279_v32 = vmul.f32 %v2853_v44, %v1420_v54  ;;  %vm1924_vm8 = vweird.f32 %v4270_v12 }
 0x2a0   : > { %v2857_v21 = vpop.eup %2856  ;;  %v1834_v4 = vadd.f32 %v4267_v31, %v4263_v25  ;;  %v4281_v51 = vmul.f32 %v2855_v49, %v1423_v52 }
 0x2a1   : > { %v2859_v35 = vpop.eup %2858  ;;  %v1906_v3 = vmul.f32 %v2857_v21, %v4240_v61  ;;  %v1899_v46 = vsel %vm1898_vm1, %v2845_v16, %v1895_v8  ;;  %v1916_v16 = vand.u32 2147483648, %v4240_v61  ;;  %vm1911_vm3 = vweird.f32 %v2857_v21 }
 0x2a2   : > { %v4277_v18 = vsel %vm1901_vm2, %v1903_v10, %v1899_v46  ;;  %v4290_v17 = vmul.f32 %v2859_v35, %v1424_v1  ;;  %v1835_v10 = vadd.f32 %v1834_v4, %v4281_v51  ;;  %v1831_v49 = vadd.f32 %v1830_v22, %v4279_v32  ;;  %vm1912_vm5 = vmor %vm1910_vm4, %vm1911_vm3 }
 0x2a3   : > { %v1907_v60 = vsub.f32 1.0, %v1906_v3  ;;  %v2085_v55 = vmul.f32 %v4277_v18, %v3890_v43  ;;  %v2086_v36 = vmul.f32 %v4277_v18, %v3894_v34  ;;  %v2087_v8 = vmul.f32 %v4277_v18, %v3906_v48 }
 0x2a4   : > { %v1914_v43 = vand.u32 2147483647, %v4240_v61  ;;  %v1836_v34 = vadd.f32 %v1835_v10, %v4290_v17  ;;  %v1917_v54 = vor.u32 1.1754944e-38, %v1916_v16  ;;  %v1930_v35 = vand.u32 2147483648, %v4270_v12 }
 0x2a5   : > { %v1908_v53 = vmul.f32 %v2857_v21, %v1907_v60  ;;  %2162 = vmatmul.f32.gmra.mxu2 %v2085_v55  ;;  %2227 = vmatmul.f32.gmra.mxu3 %v2086_v36  ;;  %v2861_v9 = vpop.eup %2860  ;;  %v4298_v1 = vpop.xlane.xlu2 %1812  ;;  %v4721_v60 = vld [vmem:[#allocation10_spill] sm:$0xff] }
 0x2a6   : > { %2292 = vmatmul.f32.gmra.mxu1 %v2087_v8  ;;  %v1920_v48 = vmul.f32 %v2861_v9, %v4270_v12  ;;  %v1803_v27 = vpop.xlane.xlu0 %1802  ;;  %1832 = vadd.xlane.f32.xlu0 %v1831_v49  ;;  %vm1915_vm6 = vcmp.eq.f32.partialorder %v1914_v43, 8.507059e+37  ;;  %vm1925_vm7 = vweird.f32 %v2861_v9  ;;  %v1931_v16 = vor.u32 1.1754944e-38, %v1930_v35 }
 0x2a7   : > { %v1909_v44 = vadd.f32 %v2857_v21, %v1908_v53  ;;  %1837 = vadd.xlane.f32.xlu1 %v1836_v34  ;;  %2862 = vrcp.f32 %v1803_v27  ;;  %vm1926_vm9 = vmor %vm1924_vm8, %vm1925_vm7  ;;  %v4722_v34 = vld [vmem:[#allocation7_spill] sm:$0xff]  ;;  %vm1938_vm12 = vweird.f32 %v1803_v27  ;;  %vm1966_vm4 = vweird.f32 %v4298_v1 }
 0x2a8   : > { %v1921_v52 = vsub.f32 1.0, %v1920_v48  ;;  %2864 = vrcp.f32 %v4298_v1 }
 0x2a9   : > { %v1913_v22 = vsel %vm1912_vm5, %v2857_v21, %v1909_v44  ;;  %v1928_v21 = vand.u32 2147483647, %v4270_v12  ;;  %v4723_v12 = vld [vmem:[#allocation34_spill] sm:$0xff] }
 0x2aa   : > { %v4301_v3 = vsel %vm1915_vm6, %v1917_v54, %v1913_v22  ;;  %v1922_v46 = vmul.f32 %v2861_v9, %v1921_v52  ;;  %v4724_v54 = vld [vmem:[#allocation35_spill] sm:$0xff]  ;;  %v1944_v22 = vand.u32 2147483648, %v1803_v27 }
 0x2ab   : > { %v2089_v61 = vmul.f32 %v4301_v3, %v3925_v28  ;;  %v2090_v4 = vmul.f32 %v4301_v3, %v3928_v7  ;;  %v2091_v55 = vmul.f32 %v4301_v3, %v4721_v60  ;;  %vm1929_vm10 = vcmp.eq.f32.partialorder %v1928_v21, 8.507059e+37 }
 0x2ac   : > { %v1923_v36 = vadd.f32 %v2861_v9, %v1922_v46  ;;  %v1945_v60 = vor.u32 1.1754944e-38, %v1944_v22 }
 0x2ad   : > { %2165 = vmatmul.f32.gmra.mxu2 %v2089_v61  ;;  %2230 = vmatmul.f32.gmra.mxu3 %v2090_v4  ;;  %v2863_v8 = vpop.eup %2862 }
 0x2ae   : > { %2295 = vmatmul.f32.gmra.mxu1 %v2091_v55  ;;  %v1808_v28 = vpop.xlane.xlu0 %1807  ;;  %v1927_v10 = vsel %vm1926_vm9, %v2861_v9, %v1923_v36  ;;  %v1934_v53 = vmul.f32 %v2863_v8, %v1803_v27  ;;  %v2865_v49 = vpop.eup %2864  ;;  %vm1939_vm11 = vweird.f32 %v2863_v8  ;;  %v1942_v9 = vand.u32 2147483647, %v1803_v27 }
 0x2af   : > { %2866 = vrcp.f32 %v1808_v28  ;;  %v4312_v7 = vsel %vm1929_vm10, %v1931_v16, %v1927_v10  ;;  %v1962_v46 = vmul.f32 %v2865_v49, %v4298_v1  ;;  %vm1940_vm13 = vmor %vm1938_vm12, %vm1939_vm11  ;;  %vm1952_vm15 = vweird.f32 %v1808_v28 }
 0x2b0   : > { %v1935_v43 = vsub.f32 1.0, %v1934_v53  ;;  %v2093_v48 = vmul.f32 %v4312_v7, %v4722_v34  ;;  %v2094_v44 = vmul.f32 %v4312_v7, %v4723_v12  ;;  %v2095_v52 = vmul.f32 %v4312_v7, %v4724_v54 }
 0x2b1   : > { %vm1943_vm14 = vcmp.eq.f32.partialorder %v1942_v9, 8.507059e+37  ;;  %v1963_v36 = vsub.f32 1.0, %v1962_v46  ;;  %v1958_v53 = vand.u32 2147483648, %v1808_v28  ;;  %v1956_v12 = vand.u32 2147483647, %v1808_v28 }
 0x2b2   : > { %v1936_v35 = vmul.f32 %v2863_v8, %v1935_v43  ;;  %vm1967_vm3 = vweird.f32 %v2865_v49  ;;  %v1970_v9 = vand.u32 2147483647, %v4298_v1 }
 0x2b3   : > { %v1959_v54 = vor.u32 1.1754944e-38, %v1958_v53  ;;  %vm1957_vm2 = vcmp.eq.f32.partialorder %v1956_v12, 8.507059e+37  ;;  %vm1968_vm5 = vmor %vm1966_vm4, %vm1967_vm3  ;;  %v1361_v12 = vunpack.c.2.s8 %v4201_v47 }
 0x2b4   : > { %v1937_v4 = vadd.f32 %v2863_v8, %v1936_v35  ;;  %vm1971_vm6 = vcmp.eq.f32.partialorder %v1970_v9, 8.507059e+37  ;;  %v1365_v9 = vunpack.c.3.s8 %v4201_v47 }
 0x2b5   : > { %2168 = vmatmul.f32.gmra.mxu2 %v2093_v48  ;;  %2233 = vmatmul.f32.gmra.mxu3 %v2094_v44  ;;  %v2867_v61 = vpop.eup %2866  ;;  %v1964_v44 = vmul.f32 %v2865_v49, %v1963_v36 }
 0x2b6   : > { %2298 = vmatmul.f32.gmra.mxu1 %v2095_v52  ;;  %v1948_v55 = vmul.f32 %v2867_v61, %v1808_v28  ;;  %v1941_v21 = vsel %vm1940_vm13, %v2863_v8, %v1937_v4  ;;  %vm1953_vm0 = vweird.f32 %v2867_v61  ;;  %v1972_v28 = vand.u32 2147483648, %v4298_v1 }
 0x2b7   : > { %v4321_v10 = vsel %vm1943_vm14, %v1945_v60, %v1941_v21  ;;  %vm1954_vm1 = vmor %vm1952_vm15, %vm1953_vm0  ;;  %v1965_v22 = vadd.f32 %v2865_v49, %v1964_v44  ;;  %v4726_v60 = vld [vmem:[#allocation14_spill] sm:$0xff]  ;;  %v1362_v44 = vunpack.c.2.s8 %v4208_v11 }
 0x2b8   : > { %v1949_v16 = vsub.f32 1.0, %v1948_v55  ;;  %v2097_v43 = vmul.f32 %v4321_v10, %v3986_v14  ;;  %v2098_v34 = vmul.f32 %v4321_v10, %v3988_v62  ;;  %v2099_v27 = vmul.f32 %v4321_v10, %v4003_v42 }
 0x2b9   : > { %v1969_v46 = vsel %vm1968_vm5, %v2865_v49, %v1965_v22 }
 0x2ba   : > { %v1950_v48 = vmul.f32 %v2867_v61, %v1949_v16 }
 0x2bc   : > { %v1951_v8 = vadd.f32 %v2867_v61, %v1950_v48 }
 0x2bd   : > { %2171 = vmatmul.f32.gmra.mxu2 %v2097_v43  ;;  %2236 = vmatmul.f32.gmra.mxu3 %v2098_v34 }
 0x2be   : > { %2301 = vmatmul.f32.gmra.mxu1 %v2099_v27  ;;  %v1955_v52 = vsel %vm1954_vm1, %v2867_v61, %v1951_v8  ;;  %v1973_v61 = vor.u32 1.1754944e-38, %v1972_v28  ;;  %v1363_v8 = vunpack.c.2.s8 %v4228_v58 }
 0x2bf   : > { %v4329_v14 = vsel %vm1957_vm2, %v1959_v54, %v1955_v52  ;;  %v1426_v54 = vcvt.s32.f32 %v1362_v44 }
 0x2c0   : > { %v2101_v62 = vmul.f32 %v4329_v14, %v4012_v6  ;;  %v2102_v42 = vmul.f32 %v4329_v14, %v4014_v24  ;;  %v2103_v35 = vmul.f32 %v4329_v14, %v4026_v15  ;;  %v4340_v6 = vsel %vm1971_vm6, %v1973_v61, %v1969_v46  ;;  %v4725_v24 = vld [vmem:[#allocation11_spill] sm:$0xff]  ;;  %v4727_v15 = vld [vmem:[#allocation5_spill] sm:$0xff] }
 0x2c1   : > { %v2105_v4 = vmul.f32 %v4340_v6, %v4725_v24  ;;  %v2106_v55 = vmul.f32 %v4340_v6, %v4726_v60  ;;  %v2107_v21 = vmul.f32 %v4340_v6, %v4727_v15 }
 0x2c5   : > { %2174 = vmatmul.f32.gmra.mxu2 %v2101_v62  ;;  %2239 = vmatmul.f32.gmra.mxu3 %v2102_v42 }
 0x2c6   : > { %2304 = vmatmul.f32.gmra.mxu1 %v2103_v35  ;;  %v1427_v35 = vcvt.s32.f32 %v1363_v8 }
 0x2cd   : > { %2177 = vmatmul.f32.gmra.mxu2 %v2105_v4  ;;  %2242 = vmatmul.f32.gmra.mxu3 %v2106_v55 }
 0x2ce   : > { %2307 = vmatmul.f32.gmra.mxu1 %v2107_v21  ;;  %v1367_v21 = vunpack.c.3.s8 %v4228_v58 }
 0x2de   : > { %v1507_v1 = vpop.xlane.xlu1 %1506 }
 0x2df   : > { %v1569_v49 = vsub.f32 %v4112_v57, %v1507_v1  ;;  %v1570_v36 = vsub.f32 %v4121_v50, %v1507_v1  ;;  %v1571_v16 = vsub.f32 %v4130_v19, %v1507_v1  ;;  %v1572_v53 = vsub.f32 %v4136_v38, %v1507_v1 }
 0x2e0   : > { %v1364_v50 = vunpack.c.2.s8 %v4231_v56  ;;  %v1425_v19 = vcvt.s32.f32 %v1361_v12  ;;  %v1429_v1 = vcvt.s32.f32 %v1365_v9 }
 0x2e1   : > { %v1689_v43 = vmul.f32 1.442695, %v1569_v49  ;;  %v1691_v34 = vmul.f32 1.442695, %v1570_v36  ;;  %v1693_v27 = vmul.f32 1.442695, %v1571_v16  ;;  %v1368_v16 = vunpack.c.3.s8 %v4231_v56 }
 0x2e2   : > { %v1695_v48 = vmul.f32 1.442695, %v1572_v53 }
 0x2e3   : > { %2868 = vpow2.f32 %v1689_v43  ;;  %v1432_v44 = vcvt.s32.f32 %v1368_v16 }
 0x2e4   : > { %2870 = vpow2.f32 %v1691_v34  ;;  %v1431_v34 = vcvt.s32.f32 %v1367_v21 }
 0x2e5   : > { %2872 = vpow2.f32 %v1693_v27 }
 0x2e6   : > { %2874 = vpow2.f32 %v1695_v48  ;;  %v1512_v57 = vpop.xlane.xlu1 %1511 }
 0x2e7   : > { %v1573_v38 = vsub.f32 %v4056_v0, %v1512_v57  ;;  %v1574_v52 = vsub.f32 %v4058_v37, %v1512_v57  ;;  %v1575_v62 = vsub.f32 %v4157_v63, %v1512_v57  ;;  %v1576_v42 = vsub.f32 %v4185_v26, %v1512_v57 }
 0x2e8   : > { %v1428_v0 = vcvt.s32.f32 %v1364_v50  ;;  %v1366_v37 = vunpack.c.3.s8 %v4208_v11 }
 0x2e9   : > { %v2869_v22 = vpop.eup %2868  ;;  %v1697_v28 = vmul.f32 1.442695, %v1573_v38  ;;  %v1699_v61 = vmul.f32 1.442695, %v1574_v52  ;;  %v1701_v24 = vmul.f32 1.442695, %v1575_v62  ;;  %v4388_v52 = vpop.xlane.xlu2 %1827 }
 0x2ea   : > { %v2871_v46 = vpop.eup %2870  ;;  %v1703_v4 = vmul.f32 1.442695, %v1576_v42  ;;  %v4361_v60 = vmul.f32 %v2869_v22, %v1425_v19  ;;  %v1430_v53 = vcvt.s32.f32 %v1366_v37  ;;  %vm2008_vm15 = vweird.f32 %v4388_v52 }
 0x2eb   : > { %v2873_v55 = vpop.eup %2872  ;;  %2876 = vpow2.f32 %v1697_v28  ;;  %v4363_v15 = vmul.f32 %v2871_v46, %v1426_v54 }
 0x2ec   : > { %v2875_v63 = vpop.eup %2874  ;;  %2878 = vpow2.f32 %v1699_v61  ;;  %v4366_v26 = vmul.f32 %v2873_v55, %v1427_v35 }
 0x2ed   : > { %2880 = vpow2.f32 %v1701_v24  ;;  %v1839_v47 = vadd.f32 %v4363_v15, %v4361_v60  ;;  %v4371_v49 = vmul.f32 %v2875_v63, %v1428_v0 }
 0x2ee   : > { %2882 = vpow2.f32 %v1703_v4  ;;  %v1823_v38 = vpop.xlane.xlu1 %1822 }
 0x2ef   : > { %v1840_v36 = vadd.f32 %v1839_v47, %v4366_v26  ;;  %2884 = vrcp.f32 %v1823_v38  ;;  %vm1994_vm12 = vweird.f32 %v1823_v38 }
 0x2f1   : > { %v2877_v11 = vpop.eup %2876  ;;  %v1841_v43 = vadd.f32 %v1840_v36, %v4371_v49 }
 0x2f2   : > { %v2879_v27 = vpop.eup %2878  ;;  %v4376_v48 = vmul.f32 %v2877_v11, %v1429_v1 }
 0x2f3   : > { %v2881_v12 = vpop.eup %2880  ;;  %1842 = vadd.xlane.f32.xlu2 %v1841_v43  ;;  %v4378_v58 = vmul.f32 %v2879_v27, %v1430_v53  ;;  %v2000_v43 = vand.u32 2147483648, %v1823_v38 }
 0x2f4   : > { %v2883_v8 = vpop.eup %2882  ;;  %v4380_v57 = vmul.f32 %v2881_v12, %v1431_v34 }
 0x2f5   : > { %v1844_v50 = vadd.f32 %v4378_v58, %v4376_v48  ;;  %v4384_v56 = vmul.f32 %v2883_v8, %v1432_v44  ;;  %v2885_v42 = vpop.eup %2884  ;;  %v1998_v8 = vand.u32 2147483647, %v1823_v38 }
 0x2f6   : > { %v1990_v22 = vmul.f32 %v2885_v42, %v1823_v38  ;;  %vm1995_vm10 = vweird.f32 %v2885_v42 }
 0x2f7   : > { %v1845_v19 = vadd.f32 %v1844_v50, %v4380_v57  ;;  %vm1996_vm13 = vmor %vm1994_vm12, %vm1995_vm10  ;;  %vm1999_vm14 = vcmp.eq.f32.partialorder %v1998_v8, 8.507059e+37 }
 0x2f8   : > { %v1991_v9 = vsub.f32 1.0, %v1990_v22 }
 0x2f9   : > { %v1846_v54 = vadd.f32 %v1845_v19, %v4384_v56 }
 0x2fa   : > { %v1992_v0 = vmul.f32 %v2885_v42, %v1991_v9 }
 0x2fb   : > { %1847 = vadd.xlane.f32.xlu0 %v1846_v54 }
 0x2fc   : > { %v1993_v53 = vadd.f32 %v2885_v42, %v1992_v0 }
 0x2fe   : > { %v1997_v54 = vsel %vm1996_vm13, %v2885_v42, %v1993_v53  ;;  %v2012_v42 = vand.u32 2147483647, %v4388_v52 }
 0x300   : > { %vm2013_vm2 = vcmp.eq.f32.partialorder %v2012_v42, 8.507059e+37 }
 0x311   : > { %v1818_v62 = vpop.xlane.xlu0 %1817 }
 0x312   : > { %2886 = vrcp.f32 %v1818_v62  ;;  %v1986_v55 = vand.u32 2147483648, %v1818_v62  ;;  %v1984_v63 = vand.u32 2147483647, %v1818_v62  ;;  %vm1980_vm8 = vweird.f32 %v1818_v62 }
 0x313   : > { %2888 = vrcp.f32 %v4388_v52 }
 0x314   : > { %v1987_v1 = vor.u32 1.1754944e-38, %v1986_v55  ;;  %vm1985_vm11 = vcmp.eq.f32.partialorder %v1984_v63, 8.507059e+37 }
 0x318   : > { %v2887_v28 = vpop.eup %2886 }
 0x319   : > { %v2889_v35 = vpop.eup %2888  ;;  %v1976_v46 = vmul.f32 %v2887_v28, %v1818_v62  ;;  %v4391_v61 = vpop.xlane.xlu0 %1832  ;;  %vm1981_vm7 = vweird.f32 %v2887_v28  ;;  %v2001_v62 = vor.u32 1.1754944e-38, %v2000_v43 }
 0x31a   : > { %v2004_v4 = vmul.f32 %v2889_v35, %v4388_v52  ;;  %2890 = vrcp.f32 %v4391_v61  ;;  %vm1982_vm9 = vmor %vm1980_vm8, %vm1981_vm7  ;;  %v4395_v36 = vpop.xlane.xlu1 %1837  ;;  %vm2009_vm0 = vweird.f32 %v2889_v35  ;;  %vm2022_vm4 = vweird.f32 %v4391_v61 }
 0x31b   : > { %v1977_v24 = vsub.f32 1.0, %v1976_v46  ;;  %2892 = vrcp.f32 %v4395_v36  ;;  %vm2010_vm1 = vmor %vm2008_vm15, %vm2009_vm0  ;;  %vm2036_vm8 = vweird.f32 %v4395_v36 }
 0x31c   : > { %v2005_v21 = vsub.f32 1.0, %v2004_v4 }
 0x31d   : > { %v1978_v37 = vmul.f32 %v2887_v28, %v1977_v24 }
 0x31e   : > { %v2006_v50 = vmul.f32 %v2889_v35, %v2005_v21 }
 0x31f   : > { %v1979_v47 = vadd.f32 %v2887_v28, %v1978_v37 }
 0x320   : > { %v2891_v11 = vpop.eup %2890  ;;  %v2007_v22 = vadd.f32 %v2889_v35, %v2006_v50 }
 0x321   : > { %v1983_v16 = vsel %vm1982_vm9, %v2887_v28, %v1979_v47  ;;  %v2018_v19 = vmul.f32 %v2891_v11, %v4391_v61  ;;  %v2893_v28 = vpop.eup %2892  ;;  %vm2023_vm3 = vweird.f32 %v2891_v11 }
 0x322   : > { %v4397_v34 = vsel %vm1985_vm11, %v1987_v1, %v1983_v16  ;;  %v2032_v4 = vmul.f32 %v2893_v28, %v4395_v36  ;;  %v2011_v55 = vsel %vm2010_vm1, %v2889_v35, %v2007_v22  ;;  %v2026_v35 = vand.u32 2147483647, %v4391_v61  ;;  %vm2024_vm5 = vmor %vm2022_vm4, %vm2023_vm3 }
 0x323   : > { %v2109_v27 = vmul.f32 %v4397_v34, %v4234_v45  ;;  %v2110_v12 = vmul.f32 %v4397_v34, %v4236_v23  ;;  %v2111_v44 = vmul.f32 %v4397_v34, %v4248_v29  ;;  %v4407_v45 = vsel %vm1999_vm14, %v2001_v62, %v1997_v54 }
 0x324   : > { %v2019_v23 = vsub.f32 1.0, %v2018_v19  ;;  %v2014_v29 = vand.u32 2147483648, %v4388_v52  ;;  %v2113_v38 = vmul.f32 %v4407_v45, %v4169_v13  ;;  %v2114_v9 = vmul.f32 %v4407_v45, %v4178_v41 }
 0x325   : > { %2180 = vmatmul.f32.gmra.mxu2 %v2109_v27  ;;  %2245 = vmatmul.f32.gmra.mxu3 %v2110_v12  ;;  %v2115_v46 = vmul.f32 %v4407_v45, %v4190_v5  ;;  %v2033_v13 = vsub.f32 1.0, %v2032_v4  ;;  %v2028_v52 = vand.u32 2147483648, %v4391_v61  ;;  %vm2027_vm6 = vcmp.eq.f32.partialorder %v2026_v35, 8.507059e+37  ;;  %v4457_v4 = vpop.f32.mrf.mxu2 }
 0x326   : > { %2310 = vmatmul.f32.gmra.mxu1 %v2111_v44  ;;  %v2020_v24 = vmul.f32 %v2891_v11, %v2019_v23  ;;  %v2015_v0 = vor.u32 1.1754944e-38, %v2014_v29  ;;  %vm2037_vm7 = vweird.f32 %v2893_v28 }
 0x327   : > { %v2034_v21 = vmul.f32 %v2893_v28, %v2033_v13  ;;  %v2029_v16 = vor.u32 1.1754944e-38, %v2028_v52  ;;  %vm2038_vm9 = vmor %vm2036_vm8, %vm2037_vm7 }
 0x328   : > { %v4419_v37 = vsel %vm2013_vm2, %v2015_v0, %v2011_v55  ;;  %v2021_v41 = vadd.f32 %v2891_v11, %v2020_v24 }
 0x329   : > { %v2117_v5 = vmul.f32 %v4419_v37, %v4125_v39  ;;  %v2118_v63 = vmul.f32 %v4419_v37, %v4132_v40  ;;  %v2119_v47 = vmul.f32 %v4419_v37, %v4138_v30  ;;  %v2035_v43 = vadd.f32 %v2893_v28, %v2034_v21  ;;  %v4729_v21 = vld [vmem:[#allocation12_spill] sm:$0xff] }
 0x32a   : > { %v2025_v1 = vsel %vm2024_vm5, %v2891_v11, %v2021_v41  ;;  %v2042_v39 = vand.u32 2147483648, %v4395_v36  ;;  %v2040_v40 = vand.u32 2147483647, %v4395_v36 }
 0x32b   : > { %v4430_v53 = vsel %vm2027_vm6, %v2029_v16, %v2025_v1  ;;  %v2039_v27 = vsel %vm2038_vm9, %v2893_v28, %v2035_v43  ;;  %v4730_v43 = vld [vmem:[#allocation28_spill] sm:$0xff] }
 0x32c   : > { %v2121_v30 = vmul.f32 %v4430_v53, %v4243_v2  ;;  %v2122_v61 = vmul.f32 %v4430_v53, %v4245_v20  ;;  %v2123_v11 = vmul.f32 %v4430_v53, %v4265_v33  ;;  %v2043_v12 = vor.u32 1.1754944e-38, %v2042_v39  ;;  %v4731_v39 = vld [vmem:[#allocation13_spill] sm:$0xff] }
 0x32d   : > { %2183 = vmatmul.f32.gmra.mxu2 %v2113_v38  ;;  %2248 = vmatmul.f32.gmra.mxu3 %v2114_v9  ;;  %vm2041_vm10 = vcmp.eq.f32.partialorder %v2040_v40, 8.507059e+37  ;;  %v2157_v35 = vpop.f32.mrf.mxu2  ;;  %v2080_v40 = vmul.f32 %v4731_v39, %v4730_v43 }
 0x32e   : > { %2313 = vmatmul.f32.gmra.mxu1 %v2115_v46  ;;  %v4441_v44 = vsel %vm2041_vm10, %v2043_v12, %v2039_v27 }
 0x32f   : > { %v2125_v36 = vmul.f32 %v4441_v44, %v4263_v25  ;;  %v2126_v2 = vmul.f32 %v4441_v44, %v4267_v31  ;;  %v2127_v20 = vmul.f32 %v4441_v44, %v4281_v51 }
 0x335   : > { %2186 = vmatmul.f32.gmra.mxu2 %v2117_v5  ;;  %2251 = vmatmul.f32.gmra.mxu3 %v2118_v63  ;;  %v4464_v16 = vpop.f32.mrf.mxu2 }
 0x336   : > { %2316 = vmatmul.f32.gmra.mxu1 %v2119_v47  ;;  %v4728_v47 = vld [vmem:[#allocation24_spill] sm:$0xff] }
 0x337   : > { %v2076_v1 = vmul.f32 %v4729_v21, %v4728_v47 }
 0x33d   : > { %2189 = vmatmul.f32.gmra.mxu2 %v2121_v30  ;;  %2254 = vmatmul.f32.gmra.mxu3 %v2122_v61  ;;  %v4468_v30 = vpop.f32.mrf.mxu2 }
 0x33e   : > { %2319 = vmatmul.f32.gmra.mxu1 %v2123_v11  ;;  %v4734_v11 = vld [vmem:[#allocation33_spill] sm:$0xff] }
 0x33f   : > { %v2088_v27 = vmul.f32 %v4277_v18, %v4734_v11  ;;  %v4738_v18 = vld [vmem:[#allocation37_spill] sm:$0xff] }
 0x345   : > { %2192 = vmatmul.f32.gmra.mxu2 %v2125_v36  ;;  %2257 = vmatmul.f32.gmra.mxu3 %v2126_v2  ;;  %v4735_v36 = vld [vmem:[#allocation8_spill] sm:$0xff] }
 0x346   : > { %2322 = vmatmul.f32.gmra.mxu1 %v2127_v20  ;;  %v2092_v2 = vmul.f32 %v4301_v3, %v4735_v36  ;;  %v4736_v20 = vld [vmem:[#allocation9_spill] sm:$0xff]  ;;  %v4739_v3 = vld [vmem:[#allocation6_spill] sm:$0xff] }
 0x366   : > { %v1843_v33 = vpop.xlane.xlu2 %1842 }
 0x367   : > { %2894 = vrcp.f32 %v1843_v33  ;;  %v2056_v62 = vand.u32 2147483648, %v1843_v33  ;;  %v2054_v25 = vand.u32 2147483647, %v1843_v33  ;;  %vm2050_vm12 = vweird.f32 %v1843_v33 }
 0x369   : > { %v2057_v28 = vor.u32 1.1754944e-38, %v2056_v62  ;;  %vm2055_vm14 = vcmp.eq.f32.partialorder %v2054_v25, 8.507059e+37  ;;  %v2104_v62 = vmul.f32 %v4329_v14, %v4738_v18  ;;  %v2108_v25 = vmul.f32 %v4340_v6, %v4739_v3  ;;  %v4741_v14 = vld [vmem:[#allocation15_spill] sm:$0xff] }
 0x36a   : > { %v2124_v6 = vmul.f32 %v4430_v53, %v4279_v32 }
 0x36d   : > { %v2895_v8 = vpop.eup %2894 }
 0x36e   : > { %v2046_v50 = vmul.f32 %v2895_v8, %v1843_v33  ;;  %v1848_v19 = vpop.xlane.xlu0 %1847  ;;  %vm2051_vm11 = vweird.f32 %v2895_v8  ;;  %v2096_v33 = vmul.f32 %v4312_v7, %v4736_v20 }
 0x36f   : > { %2896 = vrcp.f32 %v1848_v19  ;;  %vm2052_vm13 = vmor %vm2050_vm12, %vm2051_vm11  ;;  %v2070_v55 = vand.u32 2147483648, %v1848_v19  ;;  %v2068_v13 = vand.u32 2147483647, %v1848_v19  ;;  %vm2064_vm15 = vweird.f32 %v1848_v19 }
 0x370   : > { %v2047_v54 = vsub.f32 1.0, %v2046_v50  ;;  %v4737_v50 = vld [vmem:[#allocation36_spill] sm:$0xff] }
 0x371   : > { %v2071_v52 = vor.u32 1.1754944e-38, %v2070_v55  ;;  %vm2069_vm2 = vcmp.eq.f32.partialorder %v2068_v13, 8.507059e+37 }
 0x372   : > { %v2048_v23 = vmul.f32 %v2895_v8, %v2047_v54 }
 0x374   : > { %v2049_v22 = vadd.f32 %v2895_v8, %v2048_v23 }
 0x375   : > { %v2897_v31 = vpop.eup %2896 }
 0x376   : > { %v2060_v51 = vmul.f32 %v2897_v31, %v1848_v19  ;;  %v2053_v29 = vsel %vm2052_vm13, %v2895_v8, %v2049_v22  ;;  %vm2065_vm0 = vweird.f32 %v2897_v31  ;;  %v2100_v19 = vmul.f32 %v4321_v10, %v4737_v50 }
 0x377   : > { %v4449_v38 = vsel %vm2055_vm14, %v2057_v28, %v2053_v29  ;;  %vm2066_vm1 = vmor %vm2064_vm15, %vm2065_vm0  ;;  %v2112_v22 = vmul.f32 %v4397_v34, %v4254_v59  ;;  %v2219_v59 = vpop.f32.mrf.mxu3  ;;  %v2128_v34 = vmul.f32 %v4441_v44, %v4290_v17 }
 0x378   : > { %v2061_v9 = vsub.f32 1.0, %v2060_v51  ;;  %v2129_v42 = vmul.f32 %v4449_v38, %v4361_v60  ;;  %v2130_v46 = vmul.f32 %v4449_v38, %v4363_v15  ;;  %v2131_v24 = vmul.f32 %v4449_v38, %v4366_v26 }
 0x379   : > { %v2120_v51 = vmul.f32 %v4419_v37, %v4741_v14  ;;  %v2132_v37 = vmul.f32 %v4449_v38, %v4371_v49  ;;  %v2220_v44 = vadd.f32 %v2219_v59, %v4457_v4 }
 0x37a   : > { %v2062_v0 = vmul.f32 %v2897_v31, %v2061_v9  ;;  %2195 = vmatmul.f32.gmra.mxu2 %v2129_v42  ;;  %2260 = vmatmul.f32.gmra.mxu3 %v2130_v46  ;;  %v2284_v42 = vpop.f32.mrf.mxu1 }
 0x37b   : > { %2325 = vmatmul.f32.gmra.mxu1 %v2131_v24 }
 0x37c   : > { %v2063_v41 = vadd.f32 %v2897_v31, %v2062_v0 }
 0x37e   : > { %v2067_v60 = vsel %vm2066_vm1, %v2897_v31, %v2063_v41  ;;  %v4740_v31 = vld [vmem:[#allocation22_spill] sm:$0xff]  ;;  %v2285_v41 = vadd.f32 %v2284_v42, %v2220_v44 }
 0x37f   : > { %v2072_v5 = vsel %vm2069_vm2, %v2071_v52, %v2067_v60  ;;  %v2116_v28 = vmul.f32 %v4407_v45, %v4740_v31  ;;  %v2222_v46 = vpop.f32.mrf.mxu3 }
 0x380   : > { %v2133_v15 = vmul.f32 %v2072_v5, %v4376_v48  ;;  %v2134_v26 = vmul.f32 %v2072_v5, %v4378_v58  ;;  %v2135_v63 = vmul.f32 %v2072_v5, %v4380_v57  ;;  %v4732_v48 = vld [vmem:[#allocation32_spill] sm:$0xff]  ;;  %v4733_v58 = vld [vmem:[#allocation21_spill] sm:$0xff]  ;;  %v4472_v57 = vpop.f32.mrf.mxu2  ;;  %v2136_v32 = vmul.f32 %v2072_v5, %v4384_v56 }
 0x381   : > { %v2084_v61 = vmul.f32 %v4733_v58, %v4732_v48  ;;  %v2223_v60 = vadd.f32 %v2222_v46, %v2157_v35 }
 0x382   : > { %2198 = vmatmul.f32.gmra.mxu2 %v2133_v15  ;;  %2263 = vmatmul.f32.gmra.mxu3 %v2134_v26  ;;  %v2287_v55 = vpop.f32.mrf.mxu1 }
 0x383   : > { %2328 = vmatmul.f32.gmra.mxu1 %v2135_v63  ;;  %v2288_v63 = vadd.f32 %v2287_v55, %v2223_v60 }
 0x387   : > { %v2225_v53 = vpop.f32.mrf.mxu3 }
 0x388   : > { %v4476_v12 = vpop.f32.mrf.mxu2  ;;  %v2226_v21 = vadd.f32 %v2225_v53, %v4464_v16 }
 0x38a   : > { %2348 = vmatmul.f32.vlgmr.msrb.gmra.mxu2 %v2076_v1  ;;  %v2290_v17 = vpop.f32.mrf.mxu1 }
 0x38b   : > { %v2291_v35 = vadd.f32 %v2290_v17, %v2226_v21 }
 0x38f   : > { %v2228_v13 = vpop.f32.mrf.mxu3 }
 0x390   : > { %v4482_v8 = vpop.f32.mrf.mxu2  ;;  %v2229_v11 = vadd.f32 %v2228_v13, %v4468_v30 }
 0x392   : > { %2351 = vmatmul.f32.gmra.mxu2 %v2080_v40  ;;  %v2293_v38 = vpop.f32.mrf.mxu1 }
 0x393   : > { %v2294_v20 = vadd.f32 %v2293_v38, %v2229_v11 }
 0x397   : > { %v2231_v26 = vpop.f32.mrf.mxu3 }
 0x398   : > { %v4486_v54 = vpop.f32.mrf.mxu2 }
 0x39a   : > { %2354 = vmatmul.f32.gmra.mxu2 %v2084_v61  ;;  %v2296_v4 = vpop.f32.mrf.mxu1 }
 0x39f   : > { %v2234_v40 = vpop.f32.mrf.mxu3 }
 0x3a0   : > { %v4490_v23 = vpop.f32.mrf.mxu2 }
 0x3a2   : > { %2357 = vmatmul.f32.gmra.mxu2 %v2088_v27  ;;  %v2299_v36 = vpop.f32.mrf.mxu1 }
 0x3a8   : > { %v4494_v7 = vpop.f32.mrf.mxu2 }
 0x3aa   : > { %2360 = vmatmul.f32.gmra.mxu2 %v2092_v2  ;;  %v2302_v31 = vpop.f32.mrf.mxu1 }
 0x3b0   : > { %v4498_v10 = vpop.f32.mrf.mxu2 }
 0x3b2   : > { %2363 = vmatmul.f32.gmra.mxu2 %v2096_v33 }
 0x3b8   : > { %v4504_v29 = vpop.f32.mrf.mxu2 }
 0x3ba   : > { %2366 = vmatmul.f32.gmra.mxu2 %v2100_v19  ;;  %v2237_v19 = vpop.f32.mrf.mxu3 }
 0x3bb   : > { %v2238_v17 = vadd.f32 %v2237_v19, %v4482_v8 }
 0x3c0   : > { %v4508_v9 = vpop.f32.mrf.mxu2 }
 0x3c2   : > { %2369 = vmatmul.f32.gmra.mxu2 %v2104_v62  ;;  %v2232_v62 = vadd.f32 %v2231_v26, %v4472_v57 }
 0x3c8   : > { %v4512_v45 = vpop.f32.mrf.mxu2 }
 0x3ca   : > { %2372 = vmatmul.f32.gmra.mxu2 %v2108_v25 }
 0x3d2   : > { %2375 = vmatmul.f32.gmra.mxu2 %v2112_v22  ;;  %v2297_v22 = vadd.f32 %v2296_v4, %v2232_v62 }
 0x3da   : > { %2378 = vmatmul.f32.gmra.mxu2 %v2116_v28 }
 0x3e2   : > { %2381 = vmatmul.f32.gmra.mxu2 %v2120_v51 }
 0x3ea   : > { %2384 = vmatmul.f32.gmra.mxu2 %v2124_v6  ;;  %v2235_v6 = vadd.f32 %v2234_v40, %v4476_v12 }
 0x3f2   : > { %2387 = vmatmul.f32.gmra.mxu2 %v2128_v34  ;;  %v2240_v34 = vpop.f32.mrf.mxu3 }
 0x3fa   : > { %2390 = vmatmul.f32.gmra.mxu2 %v2132_v37  ;;  %v2300_v37 = vadd.f32 %v2299_v36, %v2235_v6  ;;  %v2243_v12 = vpop.f32.mrf.mxu3 }
 0x3fd   : > { %v4516_v24 = vpop.f32.mrf.mxu2 }
 0x402   : > { %2393 = vmatmul.f32.gmra.mxu2 %v2136_v32  ;;  %v2305_v32 = vpop.f32.mrf.mxu1  ;;  %v2246_v8 = vpop.f32.mrf.mxu3 }
 0x405   : > { %v4519_v0 = vpop.f32.mrf.mxu2 }
 0x40d   : > { %v2349_v52 = vpop.f32.mrf.mxu2 }
 0x40e   : > { %v2350_v49 = vadd.f32 %v2349_v52, %v2285_v41  ;;  %v2303_v52 = vadd.f32 %v2302_v31, %v2238_v17 }
 0x410   : > { %v2413_v15 = vmul.f32 1.442695, %v2350_v49  ;;  %vm2397_vm3 = vcmp.gt.f32.partialorder %v2350_v49, 0.0 }
 0x412   : > { %2898 = vpow2.f32 %v2413_v15  ;;  %v2241_v15 = vadd.f32 %v2240_v34, %v4486_v54 }
 0x415   : > { %v2352_v56 = vpop.f32.mrf.mxu2 }
 0x416   : > { %v2353_v5 = vadd.f32 %v2352_v56, %v2288_v63  ;;  %v2308_v63 = vpop.f32.mrf.mxu1 }
 0x418   : > { %v2899_v47 = vpop.eup %2898  ;;  %v2415_v1 = vmul.f32 1.442695, %v2353_v5  ;;  %vm2398_vm4 = vcmp.gt.f32.partialorder %v2353_v5, 0.0 }
 0x419   : > { %v2666_v43 = vadd.f32 -1.0, %v2899_v47  ;;  %v2306_v47 = vadd.f32 %v2305_v32, %v2241_v15 }
 0x41a   : > { %2900 = vpow2.f32 %v2415_v1 }
 0x41b   : > { %v2461_v39 = vsel %vm2397_vm3, %v2350_v49, %v2666_v43  ;;  %v2244_v43 = vadd.f32 %v2243_v12, %v4490_v23 }
 0x41c   : > { %2477 = vst [vmem:[%s4526_s20] sm:$0xff] %v2461_v39 }
 0x41d   : > { %v2355_v48 = vpop.f32.mrf.mxu2 }
 0x41e   : > { %v2356_v58 = vadd.f32 %v2355_v48, %v2291_v35  ;;  %v2311_v35 = vpop.f32.mrf.mxu1  ;;  %v2309_v48 = vadd.f32 %v2308_v63, %v2244_v43 }
 0x420   : > { %v2901_v61 = vpop.eup %2900  ;;  %v2417_v27 = vmul.f32 1.442695, %v2356_v58  ;;  %vm2399_vm5 = vcmp.gt.f32.partialorder %v2356_v58, 0.0 }
 0x421   : > { %v2667_v16 = vadd.f32 -1.0, %v2901_v61 }
 0x422   : > { %2902 = vpow2.f32 %v2417_v27 }
 0x423   : > { %v2462_v2 = vsel %vm2398_vm4, %v2353_v5, %v2667_v16  ;;  %v2247_v16 = vadd.f32 %v2246_v8, %v4494_v7 }
 0x424   : > { %2478 = vst [vmem:[%s4526_s20 + $0x8] sm:$0xff] %v2462_v2 }
 0x425   : > { %v2358_v33 = vpop.f32.mrf.mxu2 }
 0x426   : > { %v2359_v50 = vadd.f32 %v2358_v33, %v2294_v20  ;;  %v2314_v23 = vpop.f32.mrf.mxu1  ;;  %v2312_v33 = vadd.f32 %v2311_v35, %v2247_v16 }
 0x428   : > { %v2903_v18 = vpop.eup %2902  ;;  %v2419_v3 = vmul.f32 1.442695, %v2359_v50  ;;  %vm2400_vm6 = vcmp.gt.f32.partialorder %v2359_v50, 0.0 }
 0x429   : > { %v2668_v25 = vadd.f32 -1.0, %v2903_v18 }
 0x42a   : > { %2904 = vpow2.f32 %v2419_v3 }
 0x42b   : > { %v2463_v30 = vsel %vm2399_vm5, %v2356_v58, %v2668_v25  ;;  %v2249_v58 = vpop.f32.mrf.mxu3 }
 0x42c   : > { %2479 = vst [vmem:[%s4526_s20 + $0x10] sm:$0xff] %v2463_v30  ;;  %v2250_v3 = vadd.f32 %v2249_v58, %v4498_v10 }
 0x42d   : > { %v2361_v28 = vpop.f32.mrf.mxu2 }
 0x42e   : > { %v2362_v14 = vadd.f32 %v2361_v28, %v2297_v22  ;;  %v2315_v22 = vadd.f32 %v2314_v23, %v2250_v3  ;;  %v2317_v31 = vpop.f32.mrf.mxu1 }
 0x430   : > { %v2905_v51 = vpop.eup %2904  ;;  %v2421_v59 = vmul.f32 1.442695, %v2362_v14  ;;  %vm2401_vm7 = vcmp.gt.f32.partialorder %v2362_v14, 0.0 }
 0x431   : > { %v2669_v42 = vadd.f32 -1.0, %v2905_v51 }
 0x432   : > { %2906 = vpow2.f32 %v2421_v59 }
 0x433   : > { %v2464_v57 = vsel %vm2400_vm6, %v2359_v50, %v2669_v42  ;;  %v2252_v18 = vpop.f32.mrf.mxu3 }
 0x434   : > { %2480 = vst [vmem:[%s4526_s20 + $0x18] sm:$0xff] %v2464_v57  ;;  %v2253_v6 = vadd.f32 %v2252_v18, %v4504_v29 }
 0x435   : > { %v2364_v46 = vpop.f32.mrf.mxu2 }
 0x436   : > { %v2365_v55 = vadd.f32 %v2364_v46, %v2300_v37  ;;  %v2318_v57 = vadd.f32 %v2317_v31, %v2253_v6 }
 0x438   : > { %v2907_v53 = vpop.eup %2906  ;;  %v2423_v44 = vmul.f32 1.442695, %v2365_v55  ;;  %vm2402_vm8 = vcmp.gt.f32.partialorder %v2365_v55, 0.0 }
 0x439   : > { %v2670_v13 = vadd.f32 -1.0, %v2907_v53 }
 0x43a   : > { %2908 = vpow2.f32 %v2423_v44 }
 0x43b   : > { %v2465_v41 = vsel %vm2401_vm7, %v2362_v14, %v2670_v13  ;;  %v2255_v34 = vpop.f32.mrf.mxu3 }
 0x43c   : > { %2481 = vst [vmem:[%s4526_s20 + $0x20] sm:$0xff] %v2465_v41  ;;  %v2256_v53 = vadd.f32 %v2255_v34, %v4508_v9 }
 0x43d   : > { %v2367_v49 = vpop.f32.mrf.mxu2 }
 0x43e   : > { %v2368_v38 = vadd.f32 %v2367_v49, %v2303_v52 }
 0x440   : > { %v2909_v60 = vpop.eup %2908  ;;  %v2425_v26 = vmul.f32 1.442695, %v2368_v38  ;;  %vm2403_vm9 = vcmp.gt.f32.partialorder %v2368_v38, 0.0 }
 0x441   : > { %v2671_v56 = vadd.f32 -1.0, %v2909_v60 }
 0x442   : > { %2910 = vpow2.f32 %v2425_v26 }
 0x443   : > { %v2466_v5 = vsel %vm2402_vm8, %v2365_v55, %v2671_v56  ;;  %v2320_v55 = vpop.f32.mrf.mxu1  ;;  %v2258_v29 = vpop.f32.mrf.mxu3 }
 0x444   : > { %2482 = vst [vmem:[%s4526_s20 + $0x28] sm:$0xff] %v2466_v5  ;;  %v2321_v12 = vadd.f32 %v2320_v55, %v2256_v53 }
 0x445   : > { %v2370_v21 = vpop.f32.mrf.mxu2 }
 0x446   : > { %v2371_v1 = vadd.f32 %v2370_v21, %v2306_v47 }
 0x448   : > { %v2911_v4 = vpop.eup %2910  ;;  %v2427_v39 = vmul.f32 1.442695, %v2371_v1  ;;  %vm2404_vm10 = vcmp.gt.f32.partialorder %v2371_v1, 0.0 }
 0x449   : > { %v2672_v40 = vadd.f32 -1.0, %v2911_v4 }
 0x44a   : > { %2912 = vpow2.f32 %v2427_v39 }
 0x44b   : > { %v2467_v54 = vsel %vm2403_vm9, %v2368_v38, %v2672_v40  ;;  %v2259_v38 = vadd.f32 %v2258_v29, %v4512_v45  ;;  %v2323_v15 = vpop.f32.mrf.mxu1  ;;  %v2261_v9 = vpop.f32.mrf.mxu3 }
 0x44c   : > { %2483 = vst [vmem:[%s4526_s20 + $0x30] sm:$0xff] %v2467_v54  ;;  %v2262_v21 = vadd.f32 %v2261_v9, %v4516_v24 }
 0x44d   : > { %v2373_v61 = vpop.f32.mrf.mxu2  ;;  %v2324_v56 = vadd.f32 %v2323_v15, %v2259_v38 }
 0x44e   : > { %v2374_v11 = vadd.f32 %v2373_v61, %v2309_v48 }
 0x450   : > { %v2913_v27 = vpop.eup %2912  ;;  %v2429_v36 = vmul.f32 1.442695, %v2374_v11  ;;  %vm2405_vm11 = vcmp.gt.f32.partialorder %v2374_v11, 0.0 }
 0x451   : > { %v2673_v2 = vadd.f32 -1.0, %v2913_v27 }
 0x452   : > { %2914 = vpow2.f32 %v2429_v36 }
 0x453   : > { %v2468_v20 = vsel %vm2404_vm10, %v2371_v1, %v2673_v2  ;;  %v2326_v4 = vpop.f32.mrf.mxu1  ;;  %v2264_v35 = vpop.f32.mrf.mxu3 }
 0x454   : > { %2484 = vst [vmem:[%s4526_s20 + $0x38] sm:$0xff] %v2468_v20  ;;  %v2327_v39 = vadd.f32 %v2326_v4, %v2262_v21  ;;  %v2265_v58 = vadd.f32 %v2264_v35, %v4519_v0 }
 0x455   : > { %v2376_v50 = vpop.f32.mrf.mxu2 }
 0x456   : > { %v2377_v19 = vadd.f32 %v2376_v50, %v2312_v33 }
 0x458   : > { %v2915_v62 = vpop.eup %2914  ;;  %v2431_v25 = vmul.f32 1.442695, %v2377_v19  ;;  %vm2406_vm12 = vcmp.gt.f32.partialorder %v2377_v19, 0.0 }
 0x459   : > { %v2674_v30 = vadd.f32 -1.0, %v2915_v62 }
 0x45a   : > { %2916 = vpow2.f32 %v2431_v25 }
 0x45b   : > { %v2469_v7 = vsel %vm2405_vm11, %v2374_v11, %v2674_v30  ;;  %v2329_v24 = vpop.f32.mrf.mxu1 }
 0x45c   : > { %2485 = vst [vmem:[%s4526_s20 + $0x40] sm:$0xff] %v2469_v7  ;;  %v2330_v16 = vadd.f32 %v2329_v24, %v2265_v58 }
 0x45d   : > { %v2379_v28 = vpop.f32.mrf.mxu2 }
 0x45e   : > { %v2380_v14 = vadd.f32 %v2379_v28, %v2315_v22 }
 0x460   : > { %v2917_v51 = vpop.eup %2916  ;;  %v2433_v59 = vmul.f32 1.442695, %v2380_v14  ;;  %vm2407_vm13 = vcmp.gt.f32.partialorder %v2380_v14, 0.0 }
 0x461   : > { %v2675_v42 = vadd.f32 -1.0, %v2917_v51 }
 0x462   : > { %2918 = vpow2.f32 %v2433_v59 }
 0x463   : > { %v2470_v10 = vsel %vm2406_vm12, %v2377_v19, %v2675_v42 }
 0x464   : > { %2486 = vst [vmem:[%s4526_s20 + $0x48] sm:$0xff] %v2470_v10 }
 0x465   : > { %v2382_v37 = vpop.f32.mrf.mxu2 }
 0x466   : > { %v2383_v46 = vadd.f32 %v2382_v37, %v2318_v57 }
 0x468   : > { %v2919_v32 = vpop.eup %2918  ;;  %v2435_v17 = vmul.f32 1.442695, %v2383_v46  ;;  %vm2408_vm14 = vcmp.gt.f32.partialorder %v2383_v46, 0.0 }
 0x469   : > { %v2676_v44 = vadd.f32 -1.0, %v2919_v32 }
 0x46a   : > { %2920 = vpow2.f32 %v2435_v17 }
 0x46b   : > { %v2471_v13 = vsel %vm2407_vm13, %v2380_v14, %v2676_v44 }
 0x46c   : > { %2487 = vst [vmem:[%s4526_s20 + $0x50] sm:$0xff] %v2471_v13 }
 0x46d   : > { %v2385_v41 = vpop.f32.mrf.mxu2 }
 0x46e   : > { %v2386_v52 = vadd.f32 %v2385_v41, %v2321_v12 }
 0x470   : > { %v2921_v49 = vpop.eup %2920  ;;  %v2437_v60 = vmul.f32 1.442695, %v2386_v52  ;;  %vm2409_vm0 = vcmp.gt.f32.partialorder %v2386_v52, 0.0 }
 0x471   : > { %v2677_v26 = vadd.f32 -1.0, %v2921_v49 }
 0x472   : > { %2922 = vpow2.f32 %v2437_v60 }
 0x473   : > { %v2472_v63 = vsel %vm2408_vm14, %v2383_v46, %v2677_v26 }
 0x474   : > { %2488 = vst [vmem:[%s4526_s20 + $0x58] sm:$0xff] %v2472_v63 }
 0x475   : > { %v2388_v8 = vpop.f32.mrf.mxu2 }
 0x476   : > { %v2389_v5 = vadd.f32 %v2388_v8, %v2324_v56 }
 0x478   : > { %v2923_v47 = vpop.eup %2922  ;;  %v2439_v1 = vmul.f32 1.442695, %v2389_v5  ;;  %vm2410_vm15 = vcmp.gt.f32.partialorder %v2389_v5, 0.0 }
 0x479   : > { %v2678_v43 = vadd.f32 -1.0, %v2923_v47 }
 0x47a   : > { %2924 = vpow2.f32 %v2439_v1 }
 0x47b   : > { %v2473_v45 = vsel %vm2409_vm0, %v2386_v52, %v2678_v43 }
 0x47c   : > { %2489 = vst [vmem:[%s4526_s20 + $0x60] sm:$0xff] %v2473_v45 }
 0x47d   : > { %v2391_v40 = vpop.f32.mrf.mxu2 }
 0x47e   : > { %v2392_v54 = vadd.f32 %v2391_v40, %v2327_v39 }
 0x480   : > { %v2925_v48 = vpop.eup %2924  ;;  %v2441_v61 = vmul.f32 1.442695, %v2392_v54  ;;  %vm2411_vm1 = vcmp.gt.f32.partialorder %v2392_v54, 0.0 }
 0x481   : > { %v2679_v11 = vadd.f32 -1.0, %v2925_v48 }
 0x482   : > { %2926 = vpow2.f32 %v2441_v61 }
 0x483   : > { %v2474_v27 = vsel %vm2410_vm15, %v2389_v5, %v2679_v11 }
 0x484   : > { %2490 = vst [vmem:[%s4526_s20 + $0x68] sm:$0xff] %v2474_v27 }
 0x485   : > { %v2394_v36 = vpop.f32.mrf.mxu2 }
 0x486   : > { %v2395_v2 = vadd.f32 %v2394_v36, %v2330_v16 }
 0x488   : > { %v2927_v23 = vpop.eup %2926  ;;  %v2443_v20 = vmul.f32 1.442695, %v2395_v2  ;;  %vm2412_vm2 = vcmp.gt.f32.partialorder %v2395_v2, 0.0 }
 0x489   : > { %v2680_v33 = vadd.f32 -1.0, %v2927_v23 }
 0x48a   : > { %2928 = vpow2.f32 %v2443_v20 }
 0x48b   : > { %v2475_v0 = vsel %vm2411_vm1, %v2392_v54, %v2680_v33 }
 0x48c   : > { %2491 = vst [vmem:[%s4526_s20 + $0x70] sm:$0xff] %v2475_v0 }
 0x490   : > { %v2929_v50 = vpop.eup %2928 }
 0x491   : > { %v2681_v19 = vadd.f32 -1.0, %v2929_v50 }
 0x493   : > { %v2476_v18 = vsel %vm2412_vm2, %v2395_v2, %v2681_v19 }
 0x494   : > { %2492 = vst [vmem:[%s4526_s20 + $0x78] sm:$0xff] %v2476_v18 }
 0x495   : > { %2957 = shalt.err (!%p2954_p3)
}
 0x496   : > { %s2995_s18 = smov 128   ;;  %s2996_s19 = smov 8  }
 0x497   : > { %2693 = dma.vmem_to_hbm [thread:$0]  (%p3070_p5), %s2507_s10, 2048, %s2509_s9, %s2494_s25, %s2995_s18, %s2995_s18, %s2996_s19  }
 0x498 PF: > { %p2699_p4 = scmp.ge.s32.totalorder %s2992_s24, 2  ;;  %s2523_s20 = sand.u32 1, %s2980_s21  }
 0x499   : > { %s2524_s28 = scalar_lea.sflag [#allocation3], %s2523_s20 }
 0x49a   : > { %p2696_p7 = pnand %p2699_p4, %p3074_p6 }
 0x49c   : > { %p2697_p8 = pneg %p2696_p7 }
 0x49e   : > { %2975 = dma.done.wait (%p2697_p8), %s2524_s28, 2048  }
 0x49f   : > { %2977 = vsyncadd (%p2697_p8), %s2524_s28, 4294965248  ;;  %p16_p9 = scmp.ge.s32.totalorder %s3057_s27, 6   ;;  %s4742_s21 = smov %s2984_s22 }
 0x4a0   : > { %s4743_s22 = smov %s2988_s23  ;;  %s4744_s23 = smov %s3068_s30 }
 0x4a1   : > { %s4745_s24 = smov %s3057_s27  ;;  %18 = sbr.rel (!%p16_p9) target bundleno = 3 (0x3), region = 80 }
 0x4a6   :  { %2530 = vsyncpa [#allocation3], 1 }
 0x4a7   :  { %2532 = vsyncpa [#allocation3 + $0x1], 1 }

</bundles_post_ra>
